<compile_context>
chip_gen: v7x
topology: tpu7x:2x2x1
jax: 0.10.0
libtpu: 0.0.40
codegen_flags: <defaults>
</compile_context>

<pallas_src>
import functools
import math

import jax
import jax.numpy as jnp
from jax import lax
from jax.experimental import pallas as pl
from jax.experimental.pallas import tpu as pltpu  # noqa: F401

# ------------------------ alphabet / model hyper-params ---------------------
PAD_IDX, SOS_IDX, EOS_IDX, CLS_IDX, MASK_IDX = 0, 1, 2, 3, 4
VOCAB = 16                                  # len(alphabet.all_toks)
TOKENS_TO_KEEP = tuple(range(5, VOCAB))     # "amino acid" tokens
DIM = 32                                    # dim
FFN = 4 * DIM
NUM_BLOCKS = 2                              # num_transformer_blocks
NEG_INF = -1e9


# ------------------------------ in-kernel math -------------------------------
def _layer_norm(x, w, b, eps=1e-5):
    mu = jnp.mean(x, axis=-1, keepdims=True)
    var = jnp.mean(jnp.square(x - mu), axis=-1, keepdims=True)
    return (x - mu) * lax.rsqrt(var + eps) * w + b


def _coca_fused_kernel(num_enc, num_dec,
                       x_ref, valid_ref, target_ref,
                       wqkv_ref, wo_ref, w1_ref, w2_ref,
                       vecd_ref, bqkv_ref, b1_ref,
                       lnh_ref, wv_ref, bv_ref,
                       loss_ref):
    """Whole-batch forward: encoder stack -> causal decoder stack -> LN + vocab
    head -> masked cross-entropy partial sum.  Single invocation, no grid."""
    bs, d = x_ref.shape                     # (B*S, D)
    b, s = valid_ref.shape                  # (B, S)

    x = x_ref[...].astype(jnp.float32)      # (B*S, D)
    valid = valid_ref[...]                  # (B, S) f32, 1 = key is valid

    # ---- additive attention biases built in-kernel (no (B,S,S) HBM traffic) --
    key_bias = ((1.0 - valid) * NEG_INF)[:, None, :]                  # (B, 1, S)
    row = lax.broadcasted_iota(jnp.int32, (s, s), 0)
    col = lax.broadcasted_iota(jnp.int32, (s, s), 1)
    causal_bias = jnp.where(col <= row, 0.0, NEG_INF)[None].astype(jnp.float32)
    enc_bias = key_bias                                               # (B, 1, S)
    dec_bias = key_bias + causal_bias                                 # (B, S, S)

    scale = 1.0 / math.sqrt(d)

    # ---- encoder (non-causal) then BaselineDecoder (causal) blocks ----
    for li in range(num_enc + num_dec):
        bias = enc_bias if li < num_enc else dec_bias
        vec = vecd_ref[li]                   # (6, D): ln1w ln1b bo ln2w ln2b b2
        ln1w, ln1b = vec[0:1], vec[1:2]
        bo = vec[2:3]
        ln2w, ln2b = vec[3:4], vec[4:5]
        b2 = vec[5:6]
        wqkv = wqkv_ref[li]                  # (D, 3D)  bf16
        wo = wo_ref[li]                      # (D, D)   bf16
        w1 = w1_ref[li]                      # (D, FFN) bf16
        w2 = w2_ref[li]                      # (FFN, D) bf16
        bqkv = bqkv_ref[li]                  # (1, 3D)  f32
        b1 = b1_ref[li]                      # (1, FFN) f32

        # -- self-attention: single fused QKV matmul over the whole batch slab
        h = _layer_norm(x, ln1w, ln1b)
        qkv = jnp.dot(h.astype(jnp.bfloat16), wqkv,
                      preferred_element_type=jnp.float32) + bqkv      # (BS, 3D)
        q = qkv[:, :d].reshape(b, s, d)
        k = qkv[:, d:2 * d].reshape(b, s, d)
        v = qkv[:, 2 * d:].reshape(b, s, d)
        scores = jnp.einsum('bqd,bkd->bqk',
                            q.astype(jnp.bfloat16), k.astype(jnp.bfloat16),
                            preferred_element_type=jnp.float32)       # (B, S, S)
        scores = scores * scale + bias
        mx = jnp.max(scores, axis=-1, keepdims=True)
        e = jnp.exp(scores - mx)
        p = e / jnp.sum(e, axis=-1, keepdims=True)                    # exact softmax
        attn = jnp.einsum('bqk,bkd->bqd',
                          p.astype(jnp.bfloat16), v.astype(jnp.bfloat16),
                          preferred_element_type=jnp.float32)         # (B, S, D)
        attn = attn.reshape(bs, d)
        attn = jnp.dot(attn.astype(jnp.bfloat16), wo,
                       preferred_element_type=jnp.float32) + bo
        x = x + attn

        # -- feed-forward
        h2 = _layer_norm(x, ln2w, ln2b)
        f = jnp.dot(h2.astype(jnp.bfloat16), w1,
                    preferred_element_type=jnp.float32) + b1
        f = jax.nn.gelu(f)
        f = jnp.dot(f.astype(jnp.bfloat16), w2,
                    preferred_element_type=jnp.float32) + b2
        x = x + f

    # ---- LN + vocab projection head (logits never leave VMEM/vregs) ----
    lnh = lnh_ref[...]                                                # (2, D)
    h = _layer_norm(x, lnh[0:1], lnh[1:2])
    logits = jnp.dot(h.astype(jnp.bfloat16), wv_ref[...],
                     preferred_element_type=jnp.float32) + bv_ref[...]  # (BS, V)

    # ---- masked cross-entropy partial sum (ignore_index handled by target) ----
    mx = jnp.max(logits, axis=-1, keepdims=True)
    lse = jnp.log(jnp.sum(jnp.exp(logits - mx), axis=-1, keepdims=True)) + mx
    logp = logits - lse
    # target = one_hot(label) zeroed at ignore_index positions (built in JAX)
    loss_ref[...] = -jnp.sum(logp * target_ref[...], keepdims=True)   # (1, 1)


def coca_fused_forward(x2d, valid, target, stacks, *, num_enc, num_dec):
    kernel = functools.partial(_coca_fused_kernel, num_enc, num_dec)
    loss = pl.pallas_call(
        kernel,
        out_shape=jax.ShapeDtypeStruct((1, 1), jnp.float32),
    )(x2d, valid, target, *stacks)
    return loss[0, 0]


# ---------------------------- parameter init ---------------------------------
def _init_block(key, d, h):
    ks = jax.random.split(key, 6)
    n = lambda k, shp: (0.02 * jax.random.normal(k, shp)).astype(jnp.float32)
    wq, wk, wv = n(ks[0], (d, d)), n(ks[1], (d, d)), n(ks[2], (d, d))
    return dict(
        wqkv=jnp.concatenate([wq, wk, wv], axis=1),        # fused QKV (D, 3D)
        bqkv=jnp.zeros((1, 3 * d), jnp.float32),
        wo=n(ks[3], (d, d)), bo=jnp.zeros((1, d), jnp.float32),
        w1=n(ks[4], (d, h)), b1=jnp.zeros((1, h), jnp.float32),
        w2=n(ks[5], (h, d)), b2=jnp.zeros((1, d), jnp.float32),
        ln1w=jnp.ones((1, d), jnp.float32), ln1b=jnp.zeros((1, d), jnp.float32),
        ln2w=jnp.ones((1, d), jnp.float32), ln2b=jnp.zeros((1, d), jnp.float32),
    )


def init_coca_params(key):
    keys = jax.random.split(key, 2 * NUM_BLOCKS + 2)
    emb = (0.02 * jax.random.normal(keys[0], (VOCAB, DIM))).astype(jnp.float32)
    emb = emb.at[PAD_IDX].set(0.0)               # nn.Embedding(padding_idx=pad)
    # layer order: [enc_0 .. enc_{N-1}, dec_0 .. dec_{N-1}]
    blocks = [_init_block(keys[1 + i], DIM, FFN) for i in range(2 * NUM_BLOCKS)]
    stack = lambda name, dt=jnp.float32: jnp.stack(
        [blk[name] for blk in blocks]).astype(dt)
    return {
        "embedding": emb,
        # matmul weights stored bf16 (MXU operands); accumulation stays f32
        "wqkv": stack("wqkv", jnp.bfloat16),                 # (L, D, 3D)
        "wo":   stack("wo",   jnp.bfloat16),                 # (L, D, D)
        "w1":   stack("w1",   jnp.bfloat16),                 # (L, D, FFN)
        "w2":   stack("w2",   jnp.bfloat16),                 # (L, FFN, D)
        "bqkv": stack("bqkv"),                               # (L, 1, 3D) f32
        "b1":   stack("b1"),                                 # (L, 1, FFN) f32
        "vecd": jnp.stack([jnp.concatenate(
            [blk["ln1w"], blk["ln1b"], blk["bo"],
             blk["ln2w"], blk["ln2b"], blk["b2"]], axis=0)
            for blk in blocks]),                             # (L, 6, D) f32
        "lnh": jnp.concatenate([jnp.ones((1, DIM), jnp.float32),
                                jnp.zeros((1, DIM), jnp.float32)], axis=0),
        "wv": (0.02 * jax.random.normal(keys[-1], (DIM, VOCAB))).astype(jnp.bfloat16),
        "bv": jnp.zeros((1, VOCAB), jnp.float32),
        "temperature": jnp.array([0.007], jnp.float32),      # unused in sanity mode
    }


# --------------------------------- forward -----------------------------------
def coca_forward(params, sequences, key, masking_prob=0.15, random_token_prob=0.1):
    # ---- MLM masking glue (JAX).  get_sequence_mask / apply_sequence_mask /
    # apply_random_token_swap / get_attn_mask are not defined in the reference
    # snippet; plausible JAX equivalents are used here.
    # TODO(synk): exact semantics of the reference masking utilities unavailable.
    k_mask, k_swap, k_tok = jax.random.split(key, 3)
    keep = functools.reduce(jnp.logical_or, [sequences == t for t in TOKENS_TO_KEEP])
    u = jax.random.uniform(k_mask, sequences.shape)
    tokens_mask = (u < masking_prob * (1.0 - random_token_prob)) & keep
    masked = jnp.where(tokens_mask, MASK_IDX, sequences)
    if random_token_prob > 0.0:
        u2 = jax.random.uniform(k_swap, sequences.shape)
        rand_tok = jax.random.choice(k_tok, jnp.array(TOKENS_TO_KEEP, jnp.int32),
                                     sequences.shape)
        masked = jnp.where(tokens_mask & (u2 < random_token_prob), rand_tok, masked)
    decoder_labels = jnp.where(tokens_mask, sequences, PAD_IDX).astype(jnp.int32)

    b, s = sequences.shape
    # key-valid attention mask (padding); causal bias added in-kernel for decoder
    valid = (masked != PAD_IDX).astype(jnp.float32)                    # (B, S)

    # masked one-hot CE target + token count (ignore_index=pad semantics)
    labels_flat = decoder_labels.reshape(b * s)
    onehot = jax.nn.one_hot(labels_flat, VOCAB, dtype=jnp.float32)     # (B*S, V)
    tgt_valid = (labels_flat != PAD_IDX).astype(jnp.float32)
    target = onehot * tgt_valid[:, None]
    cnt = jnp.sum(tgt_valid)

    # ---- embed_sequence: embedding lookup (JAX), then fully fused Pallas fwd
    x = params["embedding"][masked].reshape(b * s, DIM)                # (B*S, D)
    stacks = (params["wqkv"], params["wo"], params["w1"], params["w2"],
              params["vecd"], params["bqkv"], params["b1"],
              params["lnh"], params["wv"], params["bv"])
    loss_sum = coca_fused_forward(x, valid, target, stacks,
                                  num_enc=NUM_BLOCKS, num_dec=NUM_BLOCKS)

    # torch F.cross_entropy(..., ignore_index=pad) averages over non-ignored tokens
    ce_loss = loss_sum / jnp.maximum(cnt, 1.0)

    # _sanity_check_mode_ (structure_encoder is None) => contrastive loss is 0
    contrastive = jnp.float32(0.0)
    total = ce_loss * 1.0 + contrastive * 1.0                          # weights = 1.0
    return {"cross entropy": ce_loss, "contrastive": contrastive, "total": total}


if __name__ == "__main__":
    key = jax.random.PRNGKey(0)
    k_params, k_mask = jax.random.split(key)
    params = init_coca_params(k_params)
    # (B=2, S=8) protein-like token sequences: sos, residues, eos, pad
    sequences = jnp.array([[SOS_IDX, 7, 9, 5, 11, 13, EOS_IDX, PAD_IDX],
                           [SOS_IDX, 6, 8, 10, 12, 14, 15, EOS_IDX]],
                          dtype=jnp.int32)
    forward = jax.jit(coca_forward)
    out = forward(params, sequences, k_mask)
    out = jax.block_until_ready(out)
    print("KERNEL_OK")
</pallas_src>

<mosaic_0001>
module attributes {stable_mosaic.version = 11 : i64} {
  func.func @_coca_fused_kernel(%arg0: memref<16x32xf32, #tpu.memory_space<vmem>>, %arg1: memref<2x8xf32, #tpu.memory_space<vmem>>, %arg2: memref<16x16xf32, #tpu.memory_space<vmem>>, %arg3: memref<4x32x96xbf16, #tpu.memory_space<vmem>>, %arg4: memref<4x32x32xbf16, #tpu.memory_space<vmem>>, %arg5: memref<4x32x128xbf16, #tpu.memory_space<vmem>>, %arg6: memref<4x128x32xbf16, #tpu.memory_space<vmem>>, %arg7: memref<4x6x32xf32, #tpu.memory_space<vmem>>, %arg8: memref<4x1x96xf32, #tpu.memory_space<vmem>>, %arg9: memref<4x1x128xf32, #tpu.memory_space<vmem>>, %arg10: memref<2x32xf32, #tpu.memory_space<vmem>>, %arg11: memref<32x16xbf16, #tpu.memory_space<vmem>>, %arg12: memref<1x16xf32, #tpu.memory_space<vmem>>, %arg13: memref<1x1xf32, #tpu.memory_space<vmem>>) attributes {dimension_semantics = [], scalar_prefetch = 0 : i64, scratch_operands = 0 : i64, tpu.core_type = #tpu.core_type<tc>} {
    %c0 = arith.constant 0 : index
    %c0_0 = arith.constant 0 : index
    %0 = vector.load %arg0[%c0, %c0_0] : memref<16x32xf32, #tpu.memory_space<vmem>>, vector<16x32xf32>
    %c0_1 = arith.constant 0 : index
    %c0_2 = arith.constant 0 : index
    %1 = vector.load %arg1[%c0_1, %c0_2] : memref<2x8xf32, #tpu.memory_space<vmem>>, vector<2x8xf32>
    %cst = arith.constant 1.000000e+00 : f32
    %2 = vector.broadcast %cst : f32 to vector<2x8xf32>
    %3 = arith.subf %2, %1 : vector<2x8xf32>
    %cst_3 = arith.constant -1.000000e+09 : f32
    %4 = vector.broadcast %cst_3 : f32 to vector<2x8xf32>
    %5 = arith.mulf %3, %4 : vector<2x8xf32>
    %6 = vector.shape_cast %5 : vector<2x8xf32> to vector<2x1x8xf32>
    %7 = tpu.iota {dimensions = array<i32: 0>} : vector<8x8xi32>
    %8 = tpu.iota {dimensions = array<i32: 1>} : vector<8x8xi32>
    %9 = arith.cmpi sle, %8, %7 : vector<8x8xi32>
    %cst_4 = arith.constant 0.000000e+00 : f32
    %cst_5 = arith.constant -1.000000e+09 : f32
    %10 = vector.broadcast %cst_4 : f32 to vector<8x8xf32>
    %11 = vector.broadcast %cst_5 : f32 to vector<8x8xf32>
    %12 = arith.select %9, %10, %11 : vector<8x8xi1>, vector<8x8xf32>
    %13 = vector.shape_cast %12 : vector<8x8xf32> to vector<1x8x8xf32>
    %14 = vector.broadcast %6 : vector<2x1x8xf32> to vector<2x8x8xf32>
    %15 = vector.broadcast %13 : vector<1x8x8xf32> to vector<2x8x8xf32>
    %16 = arith.addf %14, %15 : vector<2x8x8xf32>
    %c0_6 = arith.constant 0 : index
    %c0_7 = arith.constant 0 : index
    %c0_8 = arith.constant 0 : index
    %17 = vector.load %arg7[%c0_6, %c0_7, %c0_8] : memref<4x6x32xf32, #tpu.memory_space<vmem>>, vector<1x6x32xf32>
    %18 = vector.shape_cast %17 : vector<1x6x32xf32> to vector<6x32xf32>
    %19 = vector.extract_strided_slice %18 {offsets = [0, 0], sizes = [1, 32], strides = [1, 1]} : vector<6x32xf32> to vector<1x32xf32>
    %20 = vector.extract_strided_slice %18 {offsets = [1, 0], sizes = [1, 32], strides = [1, 1]} : vector<6x32xf32> to vector<1x32xf32>
    %21 = vector.extract_strided_slice %18 {offsets = [2, 0], sizes = [1, 32], strides = [1, 1]} : vector<6x32xf32> to vector<1x32xf32>
    %22 = vector.extract_strided_slice %18 {offsets = [3, 0], sizes = [1, 32], strides = [1, 1]} : vector<6x32xf32> to vector<1x32xf32>
    %23 = vector.extract_strided_slice %18 {offsets = [4, 0], sizes = [1, 32], strides = [1, 1]} : vector<6x32xf32> to vector<1x32xf32>
    %24 = vector.extract_strided_slice %18 {offsets = [5, 0], sizes = [1, 32], strides = [1, 1]} : vector<6x32xf32> to vector<1x32xf32>
    %c0_9 = arith.constant 0 : index
    %c0_10 = arith.constant 0 : index
    %c0_11 = arith.constant 0 : index
    %25 = vector.load %arg3[%c0_9, %c0_10, %c0_11] : memref<4x32x96xbf16, #tpu.memory_space<vmem>>, vector<1x32x96xbf16>
    %26 = vector.shape_cast %25 : vector<1x32x96xbf16> to vector<32x96xbf16>
    %c0_12 = arith.constant 0 : index
    %c0_13 = arith.constant 0 : index
    %c0_14 = arith.constant 0 : index
    %27 = vector.load %arg4[%c0_12, %c0_13, %c0_14] : memref<4x32x32xbf16, #tpu.memory_space<vmem>>, vector<1x32x32xbf16>
    %28 = vector.shape_cast %27 : vector<1x32x32xbf16> to vector<32x32xbf16>
    %c0_15 = arith.constant 0 : index
    %c0_16 = arith.constant 0 : index
    %c0_17 = arith.constant 0 : index
    %29 = vector.load %arg5[%c0_15, %c0_16, %c0_17] : memref<4x32x128xbf16, #tpu.memory_space<vmem>>, vector<1x32x128xbf16>
    %30 = vector.shape_cast %29 : vector<1x32x128xbf16> to vector<32x128xbf16>
    %c0_18 = arith.constant 0 : index
    %c0_19 = arith.constant 0 : index
    %c0_20 = arith.constant 0 : index
    %31 = vector.load %arg6[%c0_18, %c0_19, %c0_20] : memref<4x128x32xbf16, #tpu.memory_space<vmem>>, vector<1x128x32xbf16>
    %32 = vector.shape_cast %31 : vector<1x128x32xbf16> to vector<128x32xbf16>
    %c0_21 = arith.constant 0 : index
    %c0_22 = arith.constant 0 : index
    %c0_23 = arith.constant 0 : index
    %33 = vector.load %arg8[%c0_21, %c0_22, %c0_23] : memref<4x1x96xf32, #tpu.memory_space<vmem>>, vector<1x1x96xf32>
    %34 = vector.shape_cast %33 : vector<1x1x96xf32> to vector<1x96xf32>
    %c0_24 = arith.constant 0 : index
    %c0_25 = arith.constant 0 : index
    %c0_26 = arith.constant 0 : index
    %35 = vector.load %arg9[%c0_24, %c0_25, %c0_26] : memref<4x1x128xf32, #tpu.memory_space<vmem>>, vector<1x1x128xf32>
    %36 = vector.shape_cast %35 : vector<1x1x128xf32> to vector<1x128xf32>
    %cst_27 = arith.constant dense<0.000000e+00> : vector<16xf32>
    %37 = vector.multi_reduction <add>, %0, %cst_27 [1] : vector<16x32xf32> to vector<16xf32>
    %38 = vector.shape_cast %37 : vector<16xf32> to vector<16x1xf32>
    %cst_28 = arith.constant 3.200000e+01 : f32
    %39 = vector.broadcast %cst_28 : f32 to vector<16x1xf32>
    %40 = arith.divf %38, %39 : vector<16x1xf32>
    %41 = vector.broadcast %40 : vector<16x1xf32> to vector<16x32xf32>
    %42 = arith.subf %0, %41 : vector<16x32xf32>
    %43 = arith.mulf %42, %42 : vector<16x32xf32>
    %cst_29 = arith.constant dense<0.000000e+00> : vector<16xf32>
    %44 = vector.multi_reduction <add>, %43, %cst_29 [1] : vector<16x32xf32> to vector<16xf32>
    %45 = vector.shape_cast %44 : vector<16xf32> to vector<16x1xf32>
    %cst_30 = arith.constant 3.200000e+01 : f32
    %46 = vector.broadcast %cst_30 : f32 to vector<16x1xf32>
    %47 = arith.divf %45, %46 : vector<16x1xf32>
    %48 = vector.broadcast %40 : vector<16x1xf32> to vector<16x32xf32>
    %49 = arith.subf %0, %48 : vector<16x32xf32>
    %cst_31 = arith.constant 9.99999974E-6 : f32
    %50 = vector.broadcast %cst_31 : f32 to vector<16x1xf32>
    %51 = arith.addf %47, %50 : vector<16x1xf32>
    %52 = math.rsqrt %51 : vector<16x1xf32>
    %53 = vector.broadcast %52 : vector<16x1xf32> to vector<16x32xf32>
    %54 = arith.mulf %49, %53 : vector<16x32xf32>
    %55 = vector.broadcast %19 : vector<1x32xf32> to vector<16x32xf32>
    %56 = arith.mulf %54, %55 : vector<16x32xf32>
    %57 = vector.broadcast %20 : vector<1x32xf32> to vector<16x32xf32>
    %58 = arith.addf %56, %57 : vector<16x32xf32>
    %59 = arith.truncf %58 : vector<16x32xf32> to vector<16x32xbf16>
    %cst_32 = arith.constant dense<0.000000e+00> : vector<16x96xf32>
    %60 = tpu.matmul %59, %26, %cst_32 {dimension_numbers = #tpu.dot_dimension_numbers<[1], [0], [0], [1], [0, 0, 1, 1], [], []>} : vector<16x32xbf16>, vector<32x96xbf16>, vector<16x96xf32> -> vector<16x96xf32>
    %61 = vector.broadcast %34 : vector<1x96xf32> to vector<16x96xf32>
    %62 = arith.addf %60, %61 : vector<16x96xf32>
    %63 = vector.extract_strided_slice %62 {offsets = [0, 0], sizes = [16, 32], strides = [1, 1]} : vector<16x96xf32> to vector<16x32xf32>
    %64 = vector.shape_cast %63 : vector<16x32xf32> to vector<2x8x32xf32>
    %65 = vector.extract_strided_slice %62 {offsets = [0, 32], sizes = [16, 32], strides = [1, 1]} : vector<16x96xf32> to vector<16x32xf32>
    %66 = vector.shape_cast %65 : vector<16x32xf32> to vector<2x8x32xf32>
    %67 = vector.extract_strided_slice %62 {offsets = [0, 64], sizes = [16, 32], strides = [1, 1]} : vector<16x96xf32> to vector<16x32xf32>
    %68 = vector.shape_cast %67 : vector<16x32xf32> to vector<2x8x32xf32>
    %69 = arith.truncf %64 : vector<2x8x32xf32> to vector<2x8x32xbf16>
    %70 = arith.truncf %66 : vector<2x8x32xf32> to vector<2x8x32xbf16>
    "tpu.trace_start"() <{level = 10 : i32, message = "bqd,bkd->bqk"}> : () -> ()
    %cst_33 = arith.constant dense<0.000000e+00> : vector<2x8x8xf32>
    %71 = tpu.matmul %69, %70, %cst_33 {dimension_numbers = #tpu.dot_dimension_numbers<[2], [2], [1], [1], [0, 0, 0, 1, 1, 1], [0], [0]>} : vector<2x8x32xbf16>, vector<2x8x32xbf16>, vector<2x8x8xf32> -> vector<2x8x8xf32>
    "tpu.trace_stop"() : () -> ()
    %cst_34 = arith.constant 0.176776692 : f32
    %72 = vector.broadcast %cst_34 : f32 to vector<2x8x8xf32>
    %73 = arith.mulf %71, %72 : vector<2x8x8xf32>
    %74 = vector.broadcast %6 : vector<2x1x8xf32> to vector<2x8x8xf32>
    %75 = arith.addf %73, %74 : vector<2x8x8xf32>
    %cst_35 = arith.constant dense<0xFF800000> : vector<2x8xf32>
    %76 = vector.multi_reduction <maximumf>, %75, %cst_35 [2] : vector<2x8x8xf32> to vector<2x8xf32>
    %77 = vector.shape_cast %76 : vector<2x8xf32> to vector<2x8x1xf32>
    %78 = vector.broadcast %77 : vector<2x8x1xf32> to vector<2x8x8xf32>
    %79 = arith.subf %75, %78 : vector<2x8x8xf32>
    %80 = math.exp %79 : vector<2x8x8xf32>
    %cst_36 = arith.constant dense<0.000000e+00> : vector<2x8xf32>
    %81 = vector.multi_reduction <add>, %80, %cst_36 [2] : vector<2x8x8xf32> to vector<2x8xf32>
    %82 = vector.shape_cast %81 : vector<2x8xf32> to vector<2x8x1xf32>
    %83 = vector.broadcast %82 : vector<2x8x1xf32> to vector<2x8x8xf32>
    %84 = arith.divf %80, %83 : vector<2x8x8xf32>
    %85 = arith.truncf %84 : vector<2x8x8xf32> to vector<2x8x8xbf16>
    %86 = arith.truncf %68 : vector<2x8x32xf32> to vector<2x8x32xbf16>
    "tpu.trace_start"() <{level = 10 : i32, message = "bqk,bkd->bqd"}> : () -> ()
    %cst_37 = arith.constant dense<0.000000e+00> : vector<2x8x32xf32>
    %87 = tpu.matmul %85, %86, %cst_37 {dimension_numbers = #tpu.dot_dimension_numbers<[2], [1], [1], [2], [0, 0, 0, 1, 1, 2], [0], [0]>} : vector<2x8x8xbf16>, vector<2x8x32xbf16>, vector<2x8x32xf32> -> vector<2x8x32xf32>
    "tpu.trace_stop"() : () -> ()
    %88 = vector.shape_cast %87 : vector<2x8x32xf32> to vector<16x32xf32>
    %89 = arith.truncf %88 : vector<16x32xf32> to vector<16x32xbf16>
    %cst_38 = arith.constant dense<0.000000e+00> : vector<16x32xf32>
    %90 = tpu.matmul %89, %28, %cst_38 {dimension_numbers = #tpu.dot_dimension_numbers<[1], [0], [0], [1], [0, 0, 1, 1], [], []>} : vector<16x32xbf16>, vector<32x32xbf16>, vector<16x32xf32> -> vector<16x32xf32>
    %91 = vector.broadcast %21 : vector<1x32xf32> to vector<16x32xf32>
    %92 = arith.addf %90, %91 : vector<16x32xf32>
    %93 = arith.addf %0, %92 : vector<16x32xf32>
    %cst_39 = arith.constant dense<0.000000e+00> : vector<16xf32>
    %94 = vector.multi_reduction <add>, %93, %cst_39 [1] : vector<16x32xf32> to vector<16xf32>
    %95 = vector.shape_cast %94 : vector<16xf32> to vector<16x1xf32>
    %cst_40 = arith.constant 3.200000e+01 : f32
    %96 = vector.broadcast %cst_40 : f32 to vector<16x1xf32>
    %97 = arith.divf %95, %96 : vector<16x1xf32>
    %98 = vector.broadcast %97 : vector<16x1xf32> to vector<16x32xf32>
    %99 = arith.subf %93, %98 : vector<16x32xf32>
    %100 = arith.mulf %99, %99 : vector<16x32xf32>
    %cst_41 = arith.constant dense<0.000000e+00> : vector<16xf32>
    %101 = vector.multi_reduction <add>, %100, %cst_41 [1] : vector<16x32xf32> to vector<16xf32>
    %102 = vector.shape_cast %101 : vector<16xf32> to vector<16x1xf32>
    %cst_42 = arith.constant 3.200000e+01 : f32
    %103 = vector.broadcast %cst_42 : f32 to vector<16x1xf32>
    %104 = arith.divf %102, %103 : vector<16x1xf32>
    %105 = vector.broadcast %97 : vector<16x1xf32> to vector<16x32xf32>
    %106 = arith.subf %93, %105 : vector<16x32xf32>
    %cst_43 = arith.constant 9.99999974E-6 : f32
    %107 = vector.broadcast %cst_43 : f32 to vector<16x1xf32>
    %108 = arith.addf %104, %107 : vector<16x1xf32>
    %109 = math.rsqrt %108 : vector<16x1xf32>
    %110 = vector.broadcast %109 : vector<16x1xf32> to vector<16x32xf32>
    %111 = arith.mulf %106, %110 : vector<16x32xf32>
    %112 = vector.broadcast %22 : vector<1x32xf32> to vector<16x32xf32>
    %113 = arith.mulf %111, %112 : vector<16x32xf32>
    %114 = vector.broadcast %23 : vector<1x32xf32> to vector<16x32xf32>
    %115 = arith.addf %113, %114 : vector<16x32xf32>
    %116 = arith.truncf %115 : vector<16x32xf32> to vector<16x32xbf16>
    %cst_44 = arith.constant dense<0.000000e+00> : vector<16x128xf32>
    %117 = tpu.matmul %116, %30, %cst_44 {dimension_numbers = #tpu.dot_dimension_numbers<[1], [0], [0], [1], [0, 0, 1, 1], [], []>} : vector<16x32xbf16>, vector<32x128xbf16>, vector<16x128xf32> -> vector<16x128xf32>
    %118 = vector.broadcast %36 : vector<1x128xf32> to vector<16x128xf32>
    %119 = arith.addf %117, %118 : vector<16x128xf32>
    %120 = arith.mulf %119, %119 : vector<16x128xf32>
    %121 = arith.mulf %119, %120 : vector<16x128xf32>
    %cst_45 = arith.constant 4.471500e-02 : f32
    %122 = vector.broadcast %cst_45 : f32 to vector<16x128xf32>
    %123 = arith.mulf %122, %121 : vector<16x128xf32>
    %124 = arith.addf %119, %123 : vector<16x128xf32>
    %cst_46 = arith.constant 0.797884583 : f32
    %125 = vector.broadcast %cst_46 : f32 to vector<16x128xf32>
    %126 = arith.mulf %125, %124 : vector<16x128xf32>
    %127 = math.tanh %126 : vector<16x128xf32>
    %cst_47 = arith.constant 1.000000e+00 : f32
    %128 = vector.broadcast %cst_47 : f32 to vector<16x128xf32>
    %129 = arith.addf %128, %127 : vector<16x128xf32>
    %cst_48 = arith.constant 5.000000e-01 : f32
    %130 = vector.broadcast %cst_48 : f32 to vector<16x128xf32>
    %131 = arith.mulf %130, %129 : vector<16x128xf32>
    %132 = arith.mulf %119, %131 : vector<16x128xf32>
    %133 = arith.truncf %132 : vector<16x128xf32> to vector<16x128xbf16>
    %cst_49 = arith.constant dense<0.000000e+00> : vector<16x32xf32>
    %134 = tpu.matmul %133, %32, %cst_49 {dimension_numbers = #tpu.dot_dimension_numbers<[1], [0], [0], [1], [0, 0, 1, 1], [], []>} : vector<16x128xbf16>, vector<128x32xbf16>, vector<16x32xf32> -> vector<16x32xf32>
    %135 = vector.broadcast %24 : vector<1x32xf32> to vector<16x32xf32>
    %136 = arith.addf %134, %135 : vector<16x32xf32>
    %137 = arith.addf %93, %136 : vector<16x32xf32>
    %c1 = arith.constant 1 : index
    %c0_50 = arith.constant 0 : index
    %c0_51 = arith.constant 0 : index
    %138 = vector.load %arg7[%c1, %c0_50, %c0_51] : memref<4x6x32xf32, #tpu.memory_space<vmem>>, vector<1x6x32xf32>
    %139 = vector.shape_cast %138 : vector<1x6x32xf32> to vector<6x32xf32>
    %140 = vector.extract_strided_slice %139 {offsets = [0, 0], sizes = [1, 32], strides = [1, 1]} : vector<6x32xf32> to vector<1x32xf32>
    %141 = vector.extract_strided_slice %139 {offsets = [1, 0], sizes = [1, 32], strides = [1, 1]} : vector<6x32xf32> to vector<1x32xf32>
    %142 = vector.extract_strided_slice %139 {offsets = [2, 0], sizes = [1, 32], strides = [1, 1]} : vector<6x32xf32> to vector<1x32xf32>
    %143 = vector.extract_strided_slice %139 {offsets = [3, 0], sizes = [1, 32], strides = [1, 1]} : vector<6x32xf32> to vector<1x32xf32>
    %144 = vector.extract_strided_slice %139 {offsets = [4, 0], sizes = [1, 32], strides = [1, 1]} : vector<6x32xf32> to vector<1x32xf32>
    %145 = vector.extract_strided_slice %139 {offsets = [5, 0], sizes = [1, 32], strides = [1, 1]} : vector<6x32xf32> to vector<1x32xf32>
    %c1_52 = arith.constant 1 : index
    %c0_53 = arith.constant 0 : index
    %c0_54 = arith.constant 0 : index
    %146 = vector.load %arg3[%c1_52, %c0_53, %c0_54] : memref<4x32x96xbf16, #tpu.memory_space<vmem>>, vector<1x32x96xbf16>
    %147 = vector.shape_cast %146 : vector<1x32x96xbf16> to vector<32x96xbf16>
    %c1_55 = arith.constant 1 : index
    %c0_56 = arith.constant 0 : index
    %c0_57 = arith.constant 0 : index
    %148 = vector.load %arg4[%c1_55, %c0_56, %c0_57] : memref<4x32x32xbf16, #tpu.memory_space<vmem>>, vector<1x32x32xbf16>
    %149 = vector.shape_cast %148 : vector<1x32x32xbf16> to vector<32x32xbf16>
    %c1_58 = arith.constant 1 : index
    %c0_59 = arith.constant 0 : index
    %c0_60 = arith.constant 0 : index
    %150 = vector.load %arg5[%c1_58, %c0_59, %c0_60] : memref<4x32x128xbf16, #tpu.memory_space<vmem>>, vector<1x32x128xbf16>
    %151 = vector.shape_cast %150 : vector<1x32x128xbf16> to vector<32x128xbf16>
    %c1_61 = arith.constant 1 : index
    %c0_62 = arith.constant 0 : index
    %c0_63 = arith.constant 0 : index
    %152 = vector.load %arg6[%c1_61, %c0_62, %c0_63] : memref<4x128x32xbf16, #tpu.memory_space<vmem>>, vector<1x128x32xbf16>
    %153 = vector.shape_cast %152 : vector<1x128x32xbf16> to vector<128x32xbf16>
    %c1_64 = arith.constant 1 : index
    %c0_65 = arith.constant 0 : index
    %c0_66 = arith.constant 0 : index
    %154 = vector.load %arg8[%c1_64, %c0_65, %c0_66] : memref<4x1x96xf32, #tpu.memory_space<vmem>>, vector<1x1x96xf32>
    %155 = vector.shape_cast %154 : vector<1x1x96xf32> to vector<1x96xf32>
    %c1_67 = arith.constant 1 : index
    %c0_68 = arith.constant 0 : index
    %c0_69 = arith.constant 0 : index
    %156 = vector.load %arg9[%c1_67, %c0_68, %c0_69] : memref<4x1x128xf32, #tpu.memory_space<vmem>>, vector<1x1x128xf32>
    %157 = vector.shape_cast %156 : vector<1x1x128xf32> to vector<1x128xf32>
    %cst_70 = arith.constant dense<0.000000e+00> : vector<16xf32>
    %158 = vector.multi_reduction <add>, %137, %cst_70 [1] : vector<16x32xf32> to vector<16xf32>
    %159 = vector.shape_cast %158 : vector<16xf32> to vector<16x1xf32>
    %cst_71 = arith.constant 3.200000e+01 : f32
    %160 = vector.broadcast %cst_71 : f32 to vector<16x1xf32>
    %161 = arith.divf %159, %160 : vector<16x1xf32>
    %162 = vector.broadcast %161 : vector<16x1xf32> to vector<16x32xf32>
    %163 = arith.subf %137, %162 : vector<16x32xf32>
    %164 = arith.mulf %163, %163 : vector<16x32xf32>
    %cst_72 = arith.constant dense<0.000000e+00> : vector<16xf32>
    %165 = vector.multi_reduction <add>, %164, %cst_72 [1] : vector<16x32xf32> to vector<16xf32>
    %166 = vector.shape_cast %165 : vector<16xf32> to vector<16x1xf32>
    %cst_73 = arith.constant 3.200000e+01 : f32
    %167 = vector.broadcast %cst_73 : f32 to vector<16x1xf32>
    %168 = arith.divf %166, %167 : vector<16x1xf32>
    %169 = vector.broadcast %161 : vector<16x1xf32> to vector<16x32xf32>
    %170 = arith.subf %137, %169 : vector<16x32xf32>
    %cst_74 = arith.constant 9.99999974E-6 : f32
    %171 = vector.broadcast %cst_74 : f32 to vector<16x1xf32>
    %172 = arith.addf %168, %171 : vector<16x1xf32>
    %173 = math.rsqrt %172 : vector<16x1xf32>
    %174 = vector.broadcast %173 : vector<16x1xf32> to vector<16x32xf32>
    %175 = arith.mulf %170, %174 : vector<16x32xf32>
    %176 = vector.broadcast %140 : vector<1x32xf32> to vector<16x32xf32>
    %177 = arith.mulf %175, %176 : vector<16x32xf32>
    %178 = vector.broadcast %141 : vector<1x32xf32> to vector<16x32xf32>
    %179 = arith.addf %177, %178 : vector<16x32xf32>
    %180 = arith.truncf %179 : vector<16x32xf32> to vector<16x32xbf16>
    %cst_75 = arith.constant dense<0.000000e+00> : vector<16x96xf32>
    %181 = tpu.matmul %180, %147, %cst_75 {dimension_numbers = #tpu.dot_dimension_numbers<[1], [0], [0], [1], [0, 0, 1, 1], [], []>} : vector<16x32xbf16>, vector<32x96xbf16>, vector<16x96xf32> -> vector<16x96xf32>
    %182 = vector.broadcast %155 : vector<1x96xf32> to vector<16x96xf32>
    %183 = arith.addf %181, %182 : vector<16x96xf32>
    %184 = vector.extract_strided_slice %183 {offsets = [0, 0], sizes = [16, 32], strides = [1, 1]} : vector<16x96xf32> to vector<16x32xf32>
    %185 = vector.shape_cast %184 : vector<16x32xf32> to vector<2x8x32xf32>
    %186 = vector.extract_strided_slice %183 {offsets = [0, 32], sizes = [16, 32], strides = [1, 1]} : vector<16x96xf32> to vector<16x32xf32>
    %187 = vector.shape_cast %186 : vector<16x32xf32> to vector<2x8x32xf32>
    %188 = vector.extract_strided_slice %183 {offsets = [0, 64], sizes = [16, 32], strides = [1, 1]} : vector<16x96xf32> to vector<16x32xf32>
    %189 = vector.shape_cast %188 : vector<16x32xf32> to vector<2x8x32xf32>
    %190 = arith.truncf %185 : vector<2x8x32xf32> to vector<2x8x32xbf16>
    %191 = arith.truncf %187 : vector<2x8x32xf32> to vector<2x8x32xbf16>
    "tpu.trace_start"() <{level = 10 : i32, message = "bqd,bkd->bqk"}> : () -> ()
    %cst_76 = arith.constant dense<0.000000e+00> : vector<2x8x8xf32>
    %192 = tpu.matmul %190, %191, %cst_76 {dimension_numbers = #tpu.dot_dimension_numbers<[2], [2], [1], [1], [0, 0, 0, 1, 1, 1], [0], [0]>} : vector<2x8x32xbf16>, vector<2x8x32xbf16>, vector<2x8x8xf32> -> vector<2x8x8xf32>
    "tpu.trace_stop"() : () -> ()
    %cst_77 = arith.constant 0.176776692 : f32
    %193 = vector.broadcast %cst_77 : f32 to vector<2x8x8xf32>
    %194 = arith.mulf %192, %193 : vector<2x8x8xf32>
    %195 = vector.broadcast %6 : vector<2x1x8xf32> to vector<2x8x8xf32>
    %196 = arith.addf %194, %195 : vector<2x8x8xf32>
    %cst_78 = arith.constant dense<0xFF800000> : vector<2x8xf32>
    %197 = vector.multi_reduction <maximumf>, %196, %cst_78 [2] : vector<2x8x8xf32> to vector<2x8xf32>
    %198 = vector.shape_cast %197 : vector<2x8xf32> to vector<2x8x1xf32>
    %199 = vector.broadcast %198 : vector<2x8x1xf32> to vector<2x8x8xf32>
    %200 = arith.subf %196, %199 : vector<2x8x8xf32>
    %201 = math.exp %200 : vector<2x8x8xf32>
    %cst_79 = arith.constant dense<0.000000e+00> : vector<2x8xf32>
    %202 = vector.multi_reduction <add>, %201, %cst_79 [2] : vector<2x8x8xf32> to vector<2x8xf32>
    %203 = vector.shape_cast %202 : vector<2x8xf32> to vector<2x8x1xf32>
    %204 = vector.broadcast %203 : vector<2x8x1xf32> to vector<2x8x8xf32>
    %205 = arith.divf %201, %204 : vector<2x8x8xf32>
    %206 = arith.truncf %205 : vector<2x8x8xf32> to vector<2x8x8xbf16>
    %207 = arith.truncf %189 : vector<2x8x32xf32> to vector<2x8x32xbf16>
    "tpu.trace_start"() <{level = 10 : i32, message = "bqk,bkd->bqd"}> : () -> ()
    %cst_80 = arith.constant dense<0.000000e+00> : vector<2x8x32xf32>
    %208 = tpu.matmul %206, %207, %cst_80 {dimension_numbers = #tpu.dot_dimension_numbers<[2], [1], [1], [2], [0, 0, 0, 1, 1, 2], [0], [0]>} : vector<2x8x8xbf16>, vector<2x8x32xbf16>, vector<2x8x32xf32> -> vector<2x8x32xf32>
    "tpu.trace_stop"() : () -> ()
    %209 = vector.shape_cast %208 : vector<2x8x32xf32> to vector<16x32xf32>
    %210 = arith.truncf %209 : vector<16x32xf32> to vector<16x32xbf16>
    %cst_81 = arith.constant dense<0.000000e+00> : vector<16x32xf32>
    %211 = tpu.matmul %210, %149, %cst_81 {dimension_numbers = #tpu.dot_dimension_numbers<[1], [0], [0], [1], [0, 0, 1, 1], [], []>} : vector<16x32xbf16>, vector<32x32xbf16>, vector<16x32xf32> -> vector<16x32xf32>
    %212 = vector.broadcast %142 : vector<1x32xf32> to vector<16x32xf32>
    %213 = arith.addf %211, %212 : vector<16x32xf32>
    %214 = arith.addf %137, %213 : vector<16x32xf32>
    %cst_82 = arith.constant dense<0.000000e+00> : vector<16xf32>
    %215 = vector.multi_reduction <add>, %214, %cst_82 [1] : vector<16x32xf32> to vector<16xf32>
    %216 = vector.shape_cast %215 : vector<16xf32> to vector<16x1xf32>
    %cst_83 = arith.constant 3.200000e+01 : f32
    %217 = vector.broadcast %cst_83 : f32 to vector<16x1xf32>
    %218 = arith.divf %216, %217 : vector<16x1xf32>
    %219 = vector.broadcast %218 : vector<16x1xf32> to vector<16x32xf32>
    %220 = arith.subf %214, %219 : vector<16x32xf32>
    %221 = arith.mulf %220, %220 : vector<16x32xf32>
    %cst_84 = arith.constant dense<0.000000e+00> : vector<16xf32>
    %222 = vector.multi_reduction <add>, %221, %cst_84 [1] : vector<16x32xf32> to vector<16xf32>
    %223 = vector.shape_cast %222 : vector<16xf32> to vector<16x1xf32>
    %cst_85 = arith.constant 3.200000e+01 : f32
    %224 = vector.broadcast %cst_85 : f32 to vector<16x1xf32>
    %225 = arith.divf %223, %224 : vector<16x1xf32>
    %226 = vector.broadcast %218 : vector<16x1xf32> to vector<16x32xf32>
    %227 = arith.subf %214, %226 : vector<16x32xf32>
    %cst_86 = arith.constant 9.99999974E-6 : f32
    %228 = vector.broadcast %cst_86 : f32 to vector<16x1xf32>
    %229 = arith.addf %225, %228 : vector<16x1xf32>
    %230 = math.rsqrt %229 : vector<16x1xf32>
    %231 = vector.broadcast %230 : vector<16x1xf32> to vector<16x32xf32>
    %232 = arith.mulf %227, %231 : vector<16x32xf32>
    %233 = vector.broadcast %143 : vector<1x32xf32> to vector<16x32xf32>
    %234 = arith.mulf %232, %233 : vector<16x32xf32>
    %235 = vector.broadcast %144 : vector<1x32xf32> to vector<16x32xf32>
    %236 = arith.addf %234, %235 : vector<16x32xf32>
    %237 = arith.truncf %236 : vector<16x32xf32> to vector<16x32xbf16>
    %cst_87 = arith.constant dense<0.000000e+00> : vector<16x128xf32>
    %238 = tpu.matmul %237, %151, %cst_87 {dimension_numbers = #tpu.dot_dimension_numbers<[1], [0], [0], [1], [0, 0, 1, 1], [], []>} : vector<16x32xbf16>, vector<32x128xbf16>, vector<16x128xf32> -> vector<16x128xf32>
    %239 = vector.broadcast %157 : vector<1x128xf32> to vector<16x128xf32>
    %240 = arith.addf %238, %239 : vector<16x128xf32>
    %241 = arith.mulf %240, %240 : vector<16x128xf32>
    %242 = arith.mulf %240, %241 : vector<16x128xf32>
    %cst_88 = arith.constant 4.471500e-02 : f32
    %243 = vector.broadcast %cst_88 : f32 to vector<16x128xf32>
    %244 = arith.mulf %243, %242 : vector<16x128xf32>
    %245 = arith.addf %240, %244 : vector<16x128xf32>
    %cst_89 = arith.constant 0.797884583 : f32
    %246 = vector.broadcast %cst_89 : f32 to vector<16x128xf32>
    %247 = arith.mulf %246, %245 : vector<16x128xf32>
    %248 = math.tanh %247 : vector<16x128xf32>
    %cst_90 = arith.constant 1.000000e+00 : f32
    %249 = vector.broadcast %cst_90 : f32 to vector<16x128xf32>
    %250 = arith.addf %249, %248 : vector<16x128xf32>
    %cst_91 = arith.constant 5.000000e-01 : f32
    %251 = vector.broadcast %cst_91 : f32 to vector<16x128xf32>
    %252 = arith.mulf %251, %250 : vector<16x128xf32>
    %253 = arith.mulf %240, %252 : vector<16x128xf32>
    %254 = arith.truncf %253 : vector<16x128xf32> to vector<16x128xbf16>
    %cst_92 = arith.constant dense<0.000000e+00> : vector<16x32xf32>
    %255 = tpu.matmul %254, %153, %cst_92 {dimension_numbers = #tpu.dot_dimension_numbers<[1], [0], [0], [1], [0, 0, 1, 1], [], []>} : vector<16x128xbf16>, vector<128x32xbf16>, vector<16x32xf32> -> vector<16x32xf32>
    %256 = vector.broadcast %145 : vector<1x32xf32> to vector<16x32xf32>
    %257 = arith.addf %255, %256 : vector<16x32xf32>
    %258 = arith.addf %214, %257 : vector<16x32xf32>
    %c2 = arith.constant 2 : index
    %c0_93 = arith.constant 0 : index
    %c0_94 = arith.constant 0 : index
    %259 = vector.load %arg7[%c2, %c0_93, %c0_94] : memref<4x6x32xf32, #tpu.memory_space<vmem>>, vector<1x6x32xf32>
    %260 = vector.shape_cast %259 : vector<1x6x32xf32> to vector<6x32xf32>
    %261 = vector.extract_strided_slice %260 {offsets = [0, 0], sizes = [1, 32], strides = [1, 1]} : vector<6x32xf32> to vector<1x32xf32>
    %262 = vector.extract_strided_slice %260 {offsets = [1, 0], sizes = [1, 32], strides = [1, 1]} : vector<6x32xf32> to vector<1x32xf32>
    %263 = vector.extract_strided_slice %260 {offsets = [2, 0], sizes = [1, 32], strides = [1, 1]} : vector<6x32xf32> to vector<1x32xf32>
    %264 = vector.extract_strided_slice %260 {offsets = [3, 0], sizes = [1, 32], strides = [1, 1]} : vector<6x32xf32> to vector<1x32xf32>
    %265 = vector.extract_strided_slice %260 {offsets = [4, 0], sizes = [1, 32], strides = [1, 1]} : vector<6x32xf32> to vector<1x32xf32>
    %266 = vector.extract_strided_slice %260 {offsets = [5, 0], sizes = [1, 32], strides = [1, 1]} : vector<6x32xf32> to vector<1x32xf32>
    %c2_95 = arith.constant 2 : index
    %c0_96 = arith.constant 0 : index
    %c0_97 = arith.constant 0 : index
    %267 = vector.load %arg3[%c2_95, %c0_96, %c0_97] : memref<4x32x96xbf16, #tpu.memory_space<vmem>>, vector<1x32x96xbf16>
    %268 = vector.shape_cast %267 : vector<1x32x96xbf16> to vector<32x96xbf16>
    %c2_98 = arith.constant 2 : index
    %c0_99 = arith.constant 0 : index
    %c0_100 = arith.constant 0 : index
    %269 = vector.load %arg4[%c2_98, %c0_99, %c0_100] : memref<4x32x32xbf16, #tpu.memory_space<vmem>>, vector<1x32x32xbf16>
    %270 = vector.shape_cast %269 : vector<1x32x32xbf16> to vector<32x32xbf16>
    %c2_101 = arith.constant 2 : index
    %c0_102 = arith.constant 0 : index
    %c0_103 = arith.constant 0 : index
    %271 = vector.load %arg5[%c2_101, %c0_102, %c0_103] : memref<4x32x128xbf16, #tpu.memory_space<vmem>>, vector<1x32x128xbf16>
    %272 = vector.shape_cast %271 : vector<1x32x128xbf16> to vector<32x128xbf16>
    %c2_104 = arith.constant 2 : index
    %c0_105 = arith.constant 0 : index
    %c0_106 = arith.constant 0 : index
    %273 = vector.load %arg6[%c2_104, %c0_105, %c0_106] : memref<4x128x32xbf16, #tpu.memory_space<vmem>>, vector<1x128x32xbf16>
    %274 = vector.shape_cast %273 : vector<1x128x32xbf16> to vector<128x32xbf16>
    %c2_107 = arith.constant 2 : index
    %c0_108 = arith.constant 0 : index
    %c0_109 = arith.constant 0 : index
    %275 = vector.load %arg8[%c2_107, %c0_108, %c0_109] : memref<4x1x96xf32, #tpu.memory_space<vmem>>, vector<1x1x96xf32>
    %276 = vector.shape_cast %275 : vector<1x1x96xf32> to vector<1x96xf32>
    %c2_110 = arith.constant 2 : index
    %c0_111 = arith.constant 0 : index
    %c0_112 = arith.constant 0 : index
    %277 = vector.load %arg9[%c2_110, %c0_111, %c0_112] : memref<4x1x128xf32, #tpu.memory_space<vmem>>, vector<1x1x128xf32>
    %278 = vector.shape_cast %277 : vector<1x1x128xf32> to vector<1x128xf32>
    %cst_113 = arith.constant dense<0.000000e+00> : vector<16xf32>
    %279 = vector.multi_reduction <add>, %258, %cst_113 [1] : vector<16x32xf32> to vector<16xf32>
    %280 = vector.shape_cast %279 : vector<16xf32> to vector<16x1xf32>
    %cst_114 = arith.constant 3.200000e+01 : f32
    %281 = vector.broadcast %cst_114 : f32 to vector<16x1xf32>
    %282 = arith.divf %280, %281 : vector<16x1xf32>
    %283 = vector.broadcast %282 : vector<16x1xf32> to vector<16x32xf32>
    %284 = arith.subf %258, %283 : vector<16x32xf32>
    %285 = arith.mulf %284, %284 : vector<16x32xf32>
    %cst_115 = arith.constant dense<0.000000e+00> : vector<16xf32>
    %286 = vector.multi_reduction <add>, %285, %cst_115 [1] : vector<16x32xf32> to vector<16xf32>
    %287 = vector.shape_cast %286 : vector<16xf32> to vector<16x1xf32>
    %cst_116 = arith.constant 3.200000e+01 : f32
    %288 = vector.broadcast %cst_116 : f32 to vector<16x1xf32>
    %289 = arith.divf %287, %288 : vector<16x1xf32>
    %290 = vector.broadcast %282 : vector<16x1xf32> to vector<16x32xf32>
    %291 = arith.subf %258, %290 : vector<16x32xf32>
    %cst_117 = arith.constant 9.99999974E-6 : f32
    %292 = vector.broadcast %cst_117 : f32 to vector<16x1xf32>
    %293 = arith.addf %289, %292 : vector<16x1xf32>
    %294 = math.rsqrt %293 : vector<16x1xf32>
    %295 = vector.broadcast %294 : vector<16x1xf32> to vector<16x32xf32>
    %296 = arith.mulf %291, %295 : vector<16x32xf32>
    %297 = vector.broadcast %261 : vector<1x32xf32> to vector<16x32xf32>
    %298 = arith.mulf %296, %297 : vector<16x32xf32>
    %299 = vector.broadcast %262 : vector<1x32xf32> to vector<16x32xf32>
    %300 = arith.addf %298, %299 : vector<16x32xf32>
    %301 = arith.truncf %300 : vector<16x32xf32> to vector<16x32xbf16>
    %cst_118 = arith.constant dense<0.000000e+00> : vector<16x96xf32>
    %302 = tpu.matmul %301, %268, %cst_118 {dimension_numbers = #tpu.dot_dimension_numbers<[1], [0], [0], [1], [0, 0, 1, 1], [], []>} : vector<16x32xbf16>, vector<32x96xbf16>, vector<16x96xf32> -> vector<16x96xf32>
    %303 = vector.broadcast %276 : vector<1x96xf32> to vector<16x96xf32>
    %304 = arith.addf %302, %303 : vector<16x96xf32>
    %305 = vector.extract_strided_slice %304 {offsets = [0, 0], sizes = [16, 32], strides = [1, 1]} : vector<16x96xf32> to vector<16x32xf32>
    %306 = vector.shape_cast %305 : vector<16x32xf32> to vector<2x8x32xf32>
    %307 = vector.extract_strided_slice %304 {offsets = [0, 32], sizes = [16, 32], strides = [1, 1]} : vector<16x96xf32> to vector<16x32xf32>
    %308 = vector.shape_cast %307 : vector<16x32xf32> to vector<2x8x32xf32>
    %309 = vector.extract_strided_slice %304 {offsets = [0, 64], sizes = [16, 32], strides = [1, 1]} : vector<16x96xf32> to vector<16x32xf32>
    %310 = vector.shape_cast %309 : vector<16x32xf32> to vector<2x8x32xf32>
    %311 = arith.truncf %306 : vector<2x8x32xf32> to vector<2x8x32xbf16>
    %312 = arith.truncf %308 : vector<2x8x32xf32> to vector<2x8x32xbf16>
    "tpu.trace_start"() <{level = 10 : i32, message = "bqd,bkd->bqk"}> : () -> ()
    %cst_119 = arith.constant dense<0.000000e+00> : vector<2x8x8xf32>
    %313 = tpu.matmul %311, %312, %cst_119 {dimension_numbers = #tpu.dot_dimension_numbers<[2], [2], [1], [1], [0, 0, 0, 1, 1, 1], [0], [0]>} : vector<2x8x32xbf16>, vector<2x8x32xbf16>, vector<2x8x8xf32> -> vector<2x8x8xf32>
    "tpu.trace_stop"() : () -> ()
    %cst_120 = arith.constant 0.176776692 : f32
    %314 = vector.broadcast %cst_120 : f32 to vector<2x8x8xf32>
    %315 = arith.mulf %313, %314 : vector<2x8x8xf32>
    %316 = arith.addf %315, %16 : vector<2x8x8xf32>
    %cst_121 = arith.constant dense<0xFF800000> : vector<2x8xf32>
    %317 = vector.multi_reduction <maximumf>, %316, %cst_121 [2] : vector<2x8x8xf32> to vector<2x8xf32>
    %318 = vector.shape_cast %317 : vector<2x8xf32> to vector<2x8x1xf32>
    %319 = vector.broadcast %318 : vector<2x8x1xf32> to vector<2x8x8xf32>
    %320 = arith.subf %316, %319 : vector<2x8x8xf32>
    %321 = math.exp %320 : vector<2x8x8xf32>
    %cst_122 = arith.constant dense<0.000000e+00> : vector<2x8xf32>
    %322 = vector.multi_reduction <add>, %321, %cst_122 [2] : vector<2x8x8xf32> to vector<2x8xf32>
    %323 = vector.shape_cast %322 : vector<2x8xf32> to vector<2x8x1xf32>
    %324 = vector.broadcast %323 : vector<2x8x1xf32> to vector<2x8x8xf32>
    %325 = arith.divf %321, %324 : vector<2x8x8xf32>
    %326 = arith.truncf %325 : vector<2x8x8xf32> to vector<2x8x8xbf16>
    %327 = arith.truncf %310 : vector<2x8x32xf32> to vector<2x8x32xbf16>
    "tpu.trace_start"() <{level = 10 : i32, message = "bqk,bkd->bqd"}> : () -> ()
    %cst_123 = arith.constant dense<0.000000e+00> : vector<2x8x32xf32>
    %328 = tpu.matmul %326, %327, %cst_123 {dimension_numbers = #tpu.dot_dimension_numbers<[2], [1], [1], [2], [0, 0, 0, 1, 1, 2], [0], [0]>} : vector<2x8x8xbf16>, vector<2x8x32xbf16>, vector<2x8x32xf32> -> vector<2x8x32xf32>
    "tpu.trace_stop"() : () -> ()
    %329 = vector.shape_cast %328 : vector<2x8x32xf32> to vector<16x32xf32>
    %330 = arith.truncf %329 : vector<16x32xf32> to vector<16x32xbf16>
    %cst_124 = arith.constant dense<0.000000e+00> : vector<16x32xf32>
    %331 = tpu.matmul %330, %270, %cst_124 {dimension_numbers = #tpu.dot_dimension_numbers<[1], [0], [0], [1], [0, 0, 1, 1], [], []>} : vector<16x32xbf16>, vector<32x32xbf16>, vector<16x32xf32> -> vector<16x32xf32>
    %332 = vector.broadcast %263 : vector<1x32xf32> to vector<16x32xf32>
    %333 = arith.addf %331, %332 : vector<16x32xf32>
    %334 = arith.addf %258, %333 : vector<16x32xf32>
    %cst_125 = arith.constant dense<0.000000e+00> : vector<16xf32>
    %335 = vector.multi_reduction <add>, %334, %cst_125 [1] : vector<16x32xf32> to vector<16xf32>
    %336 = vector.shape_cast %335 : vector<16xf32> to vector<16x1xf32>
    %cst_126 = arith.constant 3.200000e+01 : f32
    %337 = vector.broadcast %cst_126 : f32 to vector<16x1xf32>
    %338 = arith.divf %336, %337 : vector<16x1xf32>
    %339 = vector.broadcast %338 : vector<16x1xf32> to vector<16x32xf32>
    %340 = arith.subf %334, %339 : vector<16x32xf32>
    %341 = arith.mulf %340, %340 : vector<16x32xf32>
    %cst_127 = arith.constant dense<0.000000e+00> : vector<16xf32>
    %342 = vector.multi_reduction <add>, %341, %cst_127 [1] : vector<16x32xf32> to vector<16xf32>
    %343 = vector.shape_cast %342 : vector<16xf32> to vector<16x1xf32>
    %cst_128 = arith.constant 3.200000e+01 : f32
    %344 = vector.broadcast %cst_128 : f32 to vector<16x1xf32>
    %345 = arith.divf %343, %344 : vector<16x1xf32>
    %346 = vector.broadcast %338 : vector<16x1xf32> to vector<16x32xf32>
    %347 = arith.subf %334, %346 : vector<16x32xf32>
    %cst_129 = arith.constant 9.99999974E-6 : f32
    %348 = vector.broadcast %cst_129 : f32 to vector<16x1xf32>
    %349 = arith.addf %345, %348 : vector<16x1xf32>
    %350 = math.rsqrt %349 : vector<16x1xf32>
    %351 = vector.broadcast %350 : vector<16x1xf32> to vector<16x32xf32>
    %352 = arith.mulf %347, %351 : vector<16x32xf32>
    %353 = vector.broadcast %264 : vector<1x32xf32> to vector<16x32xf32>
    %354 = arith.mulf %352, %353 : vector<16x32xf32>
    %355 = vector.broadcast %265 : vector<1x32xf32> to vector<16x32xf32>
    %356 = arith.addf %354, %355 : vector<16x32xf32>
    %357 = arith.truncf %356 : vector<16x32xf32> to vector<16x32xbf16>
    %cst_130 = arith.constant dense<0.000000e+00> : vector<16x128xf32>
    %358 = tpu.matmul %357, %272, %cst_130 {dimension_numbers = #tpu.dot_dimension_numbers<[1], [0], [0], [1], [0, 0, 1, 1], [], []>} : vector<16x32xbf16>, vector<32x128xbf16>, vector<16x128xf32> -> vector<16x128xf32>
    %359 = vector.broadcast %278 : vector<1x128xf32> to vector<16x128xf32>
    %360 = arith.addf %358, %359 : vector<16x128xf32>
    %361 = arith.mulf %360, %360 : vector<16x128xf32>
    %362 = arith.mulf %360, %361 : vector<16x128xf32>
    %cst_131 = arith.constant 4.471500e-02 : f32
    %363 = vector.broadcast %cst_131 : f32 to vector<16x128xf32>
    %364 = arith.mulf %363, %362 : vector<16x128xf32>
    %365 = arith.addf %360, %364 : vector<16x128xf32>
    %cst_132 = arith.constant 0.797884583 : f32
    %366 = vector.broadcast %cst_132 : f32 to vector<16x128xf32>
    %367 = arith.mulf %366, %365 : vector<16x128xf32>
    %368 = math.tanh %367 : vector<16x128xf32>
    %cst_133 = arith.constant 1.000000e+00 : f32
    %369 = vector.broadcast %cst_133 : f32 to vector<16x128xf32>
    %370 = arith.addf %369, %368 : vector<16x128xf32>
    %cst_134 = arith.constant 5.000000e-01 : f32
    %371 = vector.broadcast %cst_134 : f32 to vector<16x128xf32>
    %372 = arith.mulf %371, %370 : vector<16x128xf32>
    %373 = arith.mulf %360, %372 : vector<16x128xf32>
    %374 = arith.truncf %373 : vector<16x128xf32> to vector<16x128xbf16>
    %cst_135 = arith.constant dense<0.000000e+00> : vector<16x32xf32>
    %375 = tpu.matmul %374, %274, %cst_135 {dimension_numbers = #tpu.dot_dimension_numbers<[1], [0], [0], [1], [0, 0, 1, 1], [], []>} : vector<16x128xbf16>, vector<128x32xbf16>, vector<16x32xf32> -> vector<16x32xf32>
    %376 = vector.broadcast %266 : vector<1x32xf32> to vector<16x32xf32>
    %377 = arith.addf %375, %376 : vector<16x32xf32>
    %378 = arith.addf %334, %377 : vector<16x32xf32>
    %c3 = arith.constant 3 : index
    %c0_136 = arith.constant 0 : index
    %c0_137 = arith.constant 0 : index
    %379 = vector.load %arg7[%c3, %c0_136, %c0_137] : memref<4x6x32xf32, #tpu.memory_space<vmem>>, vector<1x6x32xf32>
    %380 = vector.shape_cast %379 : vector<1x6x32xf32> to vector<6x32xf32>
    %381 = vector.extract_strided_slice %380 {offsets = [0, 0], sizes = [1, 32], strides = [1, 1]} : vector<6x32xf32> to vector<1x32xf32>
    %382 = vector.extract_strided_slice %380 {offsets = [1, 0], sizes = [1, 32], strides = [1, 1]} : vector<6x32xf32> to vector<1x32xf32>
    %383 = vector.extract_strided_slice %380 {offsets = [2, 0], sizes = [1, 32], strides = [1, 1]} : vector<6x32xf32> to vector<1x32xf32>
    %384 = vector.extract_strided_slice %380 {offsets = [3, 0], sizes = [1, 32], strides = [1, 1]} : vector<6x32xf32> to vector<1x32xf32>
    %385 = vector.extract_strided_slice %380 {offsets = [4, 0], sizes = [1, 32], strides = [1, 1]} : vector<6x32xf32> to vector<1x32xf32>
    %386 = vector.extract_strided_slice %380 {offsets = [5, 0], sizes = [1, 32], strides = [1, 1]} : vector<6x32xf32> to vector<1x32xf32>
    %c3_138 = arith.constant 3 : index
    %c0_139 = arith.constant 0 : index
    %c0_140 = arith.constant 0 : index
    %387 = vector.load %arg3[%c3_138, %c0_139, %c0_140] : memref<4x32x96xbf16, #tpu.memory_space<vmem>>, vector<1x32x96xbf16>
    %388 = vector.shape_cast %387 : vector<1x32x96xbf16> to vector<32x96xbf16>
    %c3_141 = arith.constant 3 : index
    %c0_142 = arith.constant 0 : index
    %c0_143 = arith.constant 0 : index
    %389 = vector.load %arg4[%c3_141, %c0_142, %c0_143] : memref<4x32x32xbf16, #tpu.memory_space<vmem>>, vector<1x32x32xbf16>
    %390 = vector.shape_cast %389 : vector<1x32x32xbf16> to vector<32x32xbf16>
    %c3_144 = arith.constant 3 : index
    %c0_145 = arith.constant 0 : index
    %c0_146 = arith.constant 0 : index
    %391 = vector.load %arg5[%c3_144, %c0_145, %c0_146] : memref<4x32x128xbf16, #tpu.memory_space<vmem>>, vector<1x32x128xbf16>
    %392 = vector.shape_cast %391 : vector<1x32x128xbf16> to vector<32x128xbf16>
    %c3_147 = arith.constant 3 : index
    %c0_148 = arith.constant 0 : index
    %c0_149 = arith.constant 0 : index
    %393 = vector.load %arg6[%c3_147, %c0_148, %c0_149] : memref<4x128x32xbf16, #tpu.memory_space<vmem>>, vector<1x128x32xbf16>
    %394 = vector.shape_cast %393 : vector<1x128x32xbf16> to vector<128x32xbf16>
    %c3_150 = arith.constant 3 : index
    %c0_151 = arith.constant 0 : index
    %c0_152 = arith.constant 0 : index
    %395 = vector.load %arg8[%c3_150, %c0_151, %c0_152] : memref<4x1x96xf32, #tpu.memory_space<vmem>>, vector<1x1x96xf32>
    %396 = vector.shape_cast %395 : vector<1x1x96xf32> to vector<1x96xf32>
    %c3_153 = arith.constant 3 : index
    %c0_154 = arith.constant 0 : index
    %c0_155 = arith.constant 0 : index
    %397 = vector.load %arg9[%c3_153, %c0_154, %c0_155] : memref<4x1x128xf32, #tpu.memory_space<vmem>>, vector<1x1x128xf32>
    %398 = vector.shape_cast %397 : vector<1x1x128xf32> to vector<1x128xf32>
    %cst_156 = arith.constant dense<0.000000e+00> : vector<16xf32>
    %399 = vector.multi_reduction <add>, %378, %cst_156 [1] : vector<16x32xf32> to vector<16xf32>
    %400 = vector.shape_cast %399 : vector<16xf32> to vector<16x1xf32>
    %cst_157 = arith.constant 3.200000e+01 : f32
    %401 = vector.broadcast %cst_157 : f32 to vector<16x1xf32>
    %402 = arith.divf %400, %401 : vector<16x1xf32>
    %403 = vector.broadcast %402 : vector<16x1xf32> to vector<16x32xf32>
    %404 = arith.subf %378, %403 : vector<16x32xf32>
    %405 = arith.mulf %404, %404 : vector<16x32xf32>
    %cst_158 = arith.constant dense<0.000000e+00> : vector<16xf32>
    %406 = vector.multi_reduction <add>, %405, %cst_158 [1] : vector<16x32xf32> to vector<16xf32>
    %407 = vector.shape_cast %406 : vector<16xf32> to vector<16x1xf32>
    %cst_159 = arith.constant 3.200000e+01 : f32
    %408 = vector.broadcast %cst_159 : f32 to vector<16x1xf32>
    %409 = arith.divf %407, %408 : vector<16x1xf32>
    %410 = vector.broadcast %402 : vector<16x1xf32> to vector<16x32xf32>
    %411 = arith.subf %378, %410 : vector<16x32xf32>
    %cst_160 = arith.constant 9.99999974E-6 : f32
    %412 = vector.broadcast %cst_160 : f32 to vector<16x1xf32>
    %413 = arith.addf %409, %412 : vector<16x1xf32>
    %414 = math.rsqrt %413 : vector<16x1xf32>
    %415 = vector.broadcast %414 : vector<16x1xf32> to vector<16x32xf32>
    %416 = arith.mulf %411, %415 : vector<16x32xf32>
    %417 = vector.broadcast %381 : vector<1x32xf32> to vector<16x32xf32>
    %418 = arith.mulf %416, %417 : vector<16x32xf32>
    %419 = vector.broadcast %382 : vector<1x32xf32> to vector<16x32xf32>
    %420 = arith.addf %418, %419 : vector<16x32xf32>
    %421 = arith.truncf %420 : vector<16x32xf32> to vector<16x32xbf16>
    %cst_161 = arith.constant dense<0.000000e+00> : vector<16x96xf32>
    %422 = tpu.matmul %421, %388, %cst_161 {dimension_numbers = #tpu.dot_dimension_numbers<[1], [0], [0], [1], [0, 0, 1, 1], [], []>} : vector<16x32xbf16>, vector<32x96xbf16>, vector<16x96xf32> -> vector<16x96xf32>
    %423 = vector.broadcast %396 : vector<1x96xf32> to vector<16x96xf32>
    %424 = arith.addf %422, %423 : vector<16x96xf32>
    %425 = vector.extract_strided_slice %424 {offsets = [0, 0], sizes = [16, 32], strides = [1, 1]} : vector<16x96xf32> to vector<16x32xf32>
    %426 = vector.shape_cast %425 : vector<16x32xf32> to vector<2x8x32xf32>
    %427 = vector.extract_strided_slice %424 {offsets = [0, 32], sizes = [16, 32], strides = [1, 1]} : vector<16x96xf32> to vector<16x32xf32>
    %428 = vector.shape_cast %427 : vector<16x32xf32> to vector<2x8x32xf32>
    %429 = vector.extract_strided_slice %424 {offsets = [0, 64], sizes = [16, 32], strides = [1, 1]} : vector<16x96xf32> to vector<16x32xf32>
    %430 = vector.shape_cast %429 : vector<16x32xf32> to vector<2x8x32xf32>
    %431 = arith.truncf %426 : vector<2x8x32xf32> to vector<2x8x32xbf16>
    %432 = arith.truncf %428 : vector<2x8x32xf32> to vector<2x8x32xbf16>
    "tpu.trace_start"() <{level = 10 : i32, message = "bqd,bkd->bqk"}> : () -> ()
    %cst_162 = arith.constant dense<0.000000e+00> : vector<2x8x8xf32>
    %433 = tpu.matmul %431, %432, %cst_162 {dimension_numbers = #tpu.dot_dimension_numbers<[2], [2], [1], [1], [0, 0, 0, 1, 1, 1], [0], [0]>} : vector<2x8x32xbf16>, vector<2x8x32xbf16>, vector<2x8x8xf32> -> vector<2x8x8xf32>
    "tpu.trace_stop"() : () -> ()
    %cst_163 = arith.constant 0.176776692 : f32
    %434 = vector.broadcast %cst_163 : f32 to vector<2x8x8xf32>
    %435 = arith.mulf %433, %434 : vector<2x8x8xf32>
    %436 = arith.addf %435, %16 : vector<2x8x8xf32>
    %cst_164 = arith.constant dense<0xFF800000> : vector<2x8xf32>
    %437 = vector.multi_reduction <maximumf>, %436, %cst_164 [2] : vector<2x8x8xf32> to vector<2x8xf32>
    %438 = vector.shape_cast %437 : vector<2x8xf32> to vector<2x8x1xf32>
    %439 = vector.broadcast %438 : vector<2x8x1xf32> to vector<2x8x8xf32>
    %440 = arith.subf %436, %439 : vector<2x8x8xf32>
    %441 = math.exp %440 : vector<2x8x8xf32>
    %cst_165 = arith.constant dense<0.000000e+00> : vector<2x8xf32>
    %442 = vector.multi_reduction <add>, %441, %cst_165 [2] : vector<2x8x8xf32> to vector<2x8xf32>
    %443 = vector.shape_cast %442 : vector<2x8xf32> to vector<2x8x1xf32>
    %444 = vector.broadcast %443 : vector<2x8x1xf32> to vector<2x8x8xf32>
    %445 = arith.divf %441, %444 : vector<2x8x8xf32>
    %446 = arith.truncf %445 : vector<2x8x8xf32> to vector<2x8x8xbf16>
    %447 = arith.truncf %430 : vector<2x8x32xf32> to vector<2x8x32xbf16>
    "tpu.trace_start"() <{level = 10 : i32, message = "bqk,bkd->bqd"}> : () -> ()
    %cst_166 = arith.constant dense<0.000000e+00> : vector<2x8x32xf32>
    %448 = tpu.matmul %446, %447, %cst_166 {dimension_numbers = #tpu.dot_dimension_numbers<[2], [1], [1], [2], [0, 0, 0, 1, 1, 2], [0], [0]>} : vector<2x8x8xbf16>, vector<2x8x32xbf16>, vector<2x8x32xf32> -> vector<2x8x32xf32>
    "tpu.trace_stop"() : () -> ()
    %449 = vector.shape_cast %448 : vector<2x8x32xf32> to vector<16x32xf32>
    %450 = arith.truncf %449 : vector<16x32xf32> to vector<16x32xbf16>
    %cst_167 = arith.constant dense<0.000000e+00> : vector<16x32xf32>
    %451 = tpu.matmul %450, %390, %cst_167 {dimension_numbers = #tpu.dot_dimension_numbers<[1], [0], [0], [1], [0, 0, 1, 1], [], []>} : vector<16x32xbf16>, vector<32x32xbf16>, vector<16x32xf32> -> vector<16x32xf32>
    %452 = vector.broadcast %383 : vector<1x32xf32> to vector<16x32xf32>
    %453 = arith.addf %451, %452 : vector<16x32xf32>
    %454 = arith.addf %378, %453 : vector<16x32xf32>
    %cst_168 = arith.constant dense<0.000000e+00> : vector<16xf32>
    %455 = vector.multi_reduction <add>, %454, %cst_168 [1] : vector<16x32xf32> to vector<16xf32>
    %456 = vector.shape_cast %455 : vector<16xf32> to vector<16x1xf32>
    %cst_169 = arith.constant 3.200000e+01 : f32
    %457 = vector.broadcast %cst_169 : f32 to vector<16x1xf32>
    %458 = arith.divf %456, %457 : vector<16x1xf32>
    %459 = vector.broadcast %458 : vector<16x1xf32> to vector<16x32xf32>
    %460 = arith.subf %454, %459 : vector<16x32xf32>
    %461 = arith.mulf %460, %460 : vector<16x32xf32>
    %cst_170 = arith.constant dense<0.000000e+00> : vector<16xf32>
    %462 = vector.multi_reduction <add>, %461, %cst_170 [1] : vector<16x32xf32> to vector<16xf32>
    %463 = vector.shape_cast %462 : vector<16xf32> to vector<16x1xf32>
    %cst_171 = arith.constant 3.200000e+01 : f32
    %464 = vector.broadcast %cst_171 : f32 to vector<16x1xf32>
    %465 = arith.divf %463, %464 : vector<16x1xf32>
    %466 = vector.broadcast %458 : vector<16x1xf32> to vector<16x32xf32>
    %467 = arith.subf %454, %466 : vector<16x32xf32>
    %cst_172 = arith.constant 9.99999974E-6 : f32
    %468 = vector.broadcast %cst_172 : f32 to vector<16x1xf32>
    %469 = arith.addf %465, %468 : vector<16x1xf32>
    %470 = math.rsqrt %469 : vector<16x1xf32>
    %471 = vector.broadcast %470 : vector<16x1xf32> to vector<16x32xf32>
    %472 = arith.mulf %467, %471 : vector<16x32xf32>
    %473 = vector.broadcast %384 : vector<1x32xf32> to vector<16x32xf32>
    %474 = arith.mulf %472, %473 : vector<16x32xf32>
    %475 = vector.broadcast %385 : vector<1x32xf32> to vector<16x32xf32>
    %476 = arith.addf %474, %475 : vector<16x32xf32>
    %477 = arith.truncf %476 : vector<16x32xf32> to vector<16x32xbf16>
    %cst_173 = arith.constant dense<0.000000e+00> : vector<16x128xf32>
    %478 = tpu.matmul %477, %392, %cst_173 {dimension_numbers = #tpu.dot_dimension_numbers<[1], [0], [0], [1], [0, 0, 1, 1], [], []>} : vector<16x32xbf16>, vector<32x128xbf16>, vector<16x128xf32> -> vector<16x128xf32>
    %479 = vector.broadcast %398 : vector<1x128xf32> to vector<16x128xf32>
    %480 = arith.addf %478, %479 : vector<16x128xf32>
    %481 = arith.mulf %480, %480 : vector<16x128xf32>
    %482 = arith.mulf %480, %481 : vector<16x128xf32>
    %cst_174 = arith.constant 4.471500e-02 : f32
    %483 = vector.broadcast %cst_174 : f32 to vector<16x128xf32>
    %484 = arith.mulf %483, %482 : vector<16x128xf32>
    %485 = arith.addf %480, %484 : vector<16x128xf32>
    %cst_175 = arith.constant 0.797884583 : f32
    %486 = vector.broadcast %cst_175 : f32 to vector<16x128xf32>
    %487 = arith.mulf %486, %485 : vector<16x128xf32>
    %488 = math.tanh %487 : vector<16x128xf32>
    %cst_176 = arith.constant 1.000000e+00 : f32
    %489 = vector.broadcast %cst_176 : f32 to vector<16x128xf32>
    %490 = arith.addf %489, %488 : vector<16x128xf32>
    %cst_177 = arith.constant 5.000000e-01 : f32
    %491 = vector.broadcast %cst_177 : f32 to vector<16x128xf32>
    %492 = arith.mulf %491, %490 : vector<16x128xf32>
    %493 = arith.mulf %480, %492 : vector<16x128xf32>
    %494 = arith.truncf %493 : vector<16x128xf32> to vector<16x128xbf16>
    %cst_178 = arith.constant dense<0.000000e+00> : vector<16x32xf32>
    %495 = tpu.matmul %494, %394, %cst_178 {dimension_numbers = #tpu.dot_dimension_numbers<[1], [0], [0], [1], [0, 0, 1, 1], [], []>} : vector<16x128xbf16>, vector<128x32xbf16>, vector<16x32xf32> -> vector<16x32xf32>
    %496 = vector.broadcast %386 : vector<1x32xf32> to vector<16x32xf32>
    %497 = arith.addf %495, %496 : vector<16x32xf32>
    %498 = arith.addf %454, %497 : vector<16x32xf32>
    %c0_179 = arith.constant 0 : index
    %c0_180 = arith.constant 0 : index
    %499 = vector.load %arg10[%c0_179, %c0_180] : memref<2x32xf32, #tpu.memory_space<vmem>>, vector<2x32xf32>
    %500 = vector.extract_strided_slice %499 {offsets = [0, 0], sizes = [1, 32], strides = [1, 1]} : vector<2x32xf32> to vector<1x32xf32>
    %501 = vector.extract_strided_slice %499 {offsets = [1, 0], sizes = [1, 32], strides = [1, 1]} : vector<2x32xf32> to vector<1x32xf32>
    %cst_181 = arith.constant dense<0.000000e+00> : vector<16xf32>
    %502 = vector.multi_reduction <add>, %498, %cst_181 [1] : vector<16x32xf32> to vector<16xf32>
    %503 = vector.shape_cast %502 : vector<16xf32> to vector<16x1xf32>
    %cst_182 = arith.constant 3.200000e+01 : f32
    %504 = vector.broadcast %cst_182 : f32 to vector<16x1xf32>
    %505 = arith.divf %503, %504 : vector<16x1xf32>
    %506 = vector.broadcast %505 : vector<16x1xf32> to vector<16x32xf32>
    %507 = arith.subf %498, %506 : vector<16x32xf32>
    %508 = arith.mulf %507, %507 : vector<16x32xf32>
    %cst_183 = arith.constant dense<0.000000e+00> : vector<16xf32>
    %509 = vector.multi_reduction <add>, %508, %cst_183 [1] : vector<16x32xf32> to vector<16xf32>
    %510 = vector.shape_cast %509 : vector<16xf32> to vector<16x1xf32>
    %cst_184 = arith.constant 3.200000e+01 : f32
    %511 = vector.broadcast %cst_184 : f32 to vector<16x1xf32>
    %512 = arith.divf %510, %511 : vector<16x1xf32>
    %513 = vector.broadcast %505 : vector<16x1xf32> to vector<16x32xf32>
    %514 = arith.subf %498, %513 : vector<16x32xf32>
    %cst_185 = arith.constant 9.99999974E-6 : f32
    %515 = vector.broadcast %cst_185 : f32 to vector<16x1xf32>
    %516 = arith.addf %512, %515 : vector<16x1xf32>
    %517 = math.rsqrt %516 : vector<16x1xf32>
    %518 = vector.broadcast %517 : vector<16x1xf32> to vector<16x32xf32>
    %519 = arith.mulf %514, %518 : vector<16x32xf32>
    %520 = vector.broadcast %500 : vector<1x32xf32> to vector<16x32xf32>
    %521 = arith.mulf %519, %520 : vector<16x32xf32>
    %522 = vector.broadcast %501 : vector<1x32xf32> to vector<16x32xf32>
    %523 = arith.addf %521, %522 : vector<16x32xf32>
    %524 = arith.truncf %523 : vector<16x32xf32> to vector<16x32xbf16>
    %c0_186 = arith.constant 0 : index
    %c0_187 = arith.constant 0 : index
    %525 = vector.load %arg11[%c0_186, %c0_187] : memref<32x16xbf16, #tpu.memory_space<vmem>>, vector<32x16xbf16>
    %cst_188 = arith.constant dense<0.000000e+00> : vector<16x16xf32>
    %526 = tpu.matmul %524, %525, %cst_188 {dimension_numbers = #tpu.dot_dimension_numbers<[1], [0], [0], [1], [0, 0, 1, 1], [], []>} : vector<16x32xbf16>, vector<32x16xbf16>, vector<16x16xf32> -> vector<16x16xf32>
    %c0_189 = arith.constant 0 : index
    %c0_190 = arith.constant 0 : index
    %527 = vector.load %arg12[%c0_189, %c0_190] : memref<1x16xf32, #tpu.memory_space<vmem>>, vector<1x16xf32>
    %528 = vector.broadcast %527 : vector<1x16xf32> to vector<16x16xf32>
    %529 = arith.addf %526, %528 : vector<16x16xf32>
    %cst_191 = arith.constant dense<0xFF800000> : vector<16xf32>
    %530 = vector.multi_reduction <maximumf>, %529, %cst_191 [1] : vector<16x16xf32> to vector<16xf32>
    %531 = vector.shape_cast %530 : vector<16xf32> to vector<16x1xf32>
    %532 = vector.broadcast %531 : vector<16x1xf32> to vector<16x16xf32>
    %533 = arith.subf %529, %532 : vector<16x16xf32>
    %534 = math.exp %533 : vector<16x16xf32>
    %cst_192 = arith.constant dense<0.000000e+00> : vector<16xf32>
    %535 = vector.multi_reduction <add>, %534, %cst_192 [1] : vector<16x16xf32> to vector<16xf32>
    %536 = vector.shape_cast %535 : vector<16xf32> to vector<16x1xf32>
    %537 = math.log %536 : vector<16x1xf32>
    %538 = arith.addf %537, %531 : vector<16x1xf32>
    %539 = vector.broadcast %538 : vector<16x1xf32> to vector<16x16xf32>
    %540 = arith.subf %529, %539 : vector<16x16xf32>
    %c0_193 = arith.constant 0 : index
    %c0_194 = arith.constant 0 : index
    %541 = vector.load %arg2[%c0_193, %c0_194] : memref<16x16xf32, #tpu.memory_space<vmem>>, vector<16x16xf32>
    %542 = arith.mulf %540, %541 : vector<16x16xf32>
    %543 = vector.shape_cast %542 : vector<16x16xf32> to vector<1x16x16xf32>
    %cst_195 = arith.constant dense<0.000000e+00> : vector<1xf32>
    %544 = vector.multi_reduction <add>, %543, %cst_195 [1, 2] : vector<1x16x16xf32> to vector<1xf32>
    %545 = vector.shape_cast %544 : vector<1xf32> to vector<1x1x1xf32>
    %546 = vector.extract %545[0, 0, 0] : f32 from vector<1x1x1xf32>
    %547 = vector.broadcast %546 : f32 to vector<1x1xf32>
    %cst_196 = arith.constant 0.000000e+00 : f32
    %548 = vector.broadcast %cst_196 : f32 to vector<1x1xf32>
    %549 = arith.subf %548, %547 : vector<1x1xf32>
    %c0_197 = arith.constant 0 : index
    %c0_198 = arith.constant 0 : index
    %550 = vector.load %arg13[%c0_197, %c0_198] : memref<1x1xf32, #tpu.memory_space<vmem>>, vector<1x1xf32>
    tpu.vector_store %arg13[%c0_197, %c0_198], %549 {strides = array<i32>} : memref<1x1xf32, #tpu.memory_space<vmem>>, vector<1x1xf32>,
    return
  }
}

</mosaic_0001>

<bundles_post_ra>
// kernel: coca_forward.3
= control target key start
LH: loop header
LB: loop body
LE: loop exit
PB: predicated region body
PF: predicated region fallthrough
CT: control target
= control target key end

     0   :  { %vm123_vm0 = vcmask 261120   ;;  %s4346_s0 = inlined_call_operand.vmem [shape: f32[16,32], index: 0, kind: input, shape index: {}]   ;;  %s4347_s1 = inlined_call_operand.vmem [shape: f32[2,8], index: 1, kind: input, shape index: {}]   ;;  %s4348_s2 = inlined_call_operand.vmem [shape: f32[16,16], index: 2, kind: input, shape index: {}]   ;;  %s4349_s3 = inlined_call_operand.vmem [shape: bf16[4,32,96], index: 3, kind: input, shape index: {}]   ;;  %s4350_s4 = inlined_call_operand.vmem [shape: bf16[4,32,32], index: 4, kind: input, shape index: {}]   ;;  %s4351_s5 = inlined_call_operand.vmem [shape: bf16[4,32,128], index: 5, kind: input, shape index: {}]   ;;  %s4352_s6 = inlined_call_operand.vmem [shape: bf16[4,128,32], index: 6, kind: input, shape index: {}]   ;;  %s4353_s7 = inlined_call_operand.vmem [shape: f32[4,6,32], index: 7, kind: input, shape index: {}]   ;;  %s4354_s8 = inlined_call_operand.vmem [shape: f32[4,1,96], index: 8, kind: input, shape index: {}]   ;;  %s4355_s9 = inlined_call_operand.vmem [shape: f32[4,1,128], index: 9, kind: input, shape index: {}]   ;;  %s4356_s10 = inlined_call_operand.vmem [shape: f32[2,32], index: 10, kind: input, shape index: {}]   ;;  %s4357_s11 = inlined_call_operand.vmem [shape: bf16[32,16], index: 11, kind: input, shape index: {}]   ;;  %s4358_s12 = inlined_call_operand.vmem [shape: f32[1,16], index: 12, kind: input, shape index: {}]   ;;  %s4359_s13 = inlined_call_operand.hbm [shape: f32[1,1], index: 13, kind: output, shape index: {}]  }
   0x1   :  { %v3660_v0 = vld [vmem:[%s4346_s0] sm:$0xff]  ;;  %v3665_v1 = vld [vmem:[%s4346_s0 + $0x8] sm:$0xff] }
   0x2   :  { %v124_v2 = vsel %vm123_vm0, %v3660_v0, 0.0  ;;  %v127_v3 = vsel %vm123_vm0, %v3665_v1, 0.0 }
   0x3   :  { %125 = vadd.xlane.f32.xlu0 %v124_v2 }
   0x7   :  { %128 = vadd.xlane.f32.xlu0 %v127_v3 }
   0x8   :  { %18 = vsyncpa [#allocation3], 0  ;;  %v3406_v14 = vld [vmem:[%s4349_s3] sm:$0xff]   ;;  %v3580_v15 = vmov 0.0   ;;  %v3407_v16 = vld [vmem:[%s4349_s3 + $0x8] sm:$0xff]   ;;  %vm3581_vm1 = vmmov 0   ;;  %v55_v21 = vlaneseq }
   0x9   :  { %3117 = vmatprep.subr.bf16.mxu1 %v3580_v15  ;;  %3131 = vmatprep.subr.bf16.mxu0 %v3580_v15  ;;  %v3698_v26 = vld [vmem:[%s4353_s7] sm:$0x3f]  ;;  %s3582_s19 = smov 96   ;;  %v3583_v52 = vmov 1966171168   ;;  %vm330_vm2 = vcmask 64512  }
   0xa   :  { %3118 = vmatpush3.bf16.msra.mxu1 %v3406_v14  ;;  %3121 = vmatprep.mubr.msk.bf16.mxu1 %vm3581_vm1, %v3580_v15  ;;  %v3690_v24 = vshrl.u32 %v55_v21, 7  ;;  %v2821_v39 = vld [vmem:[%s4354_s8] ss:$0 sm:$0xff]  ;;  %v53_v53 = vunpack.c.l.s4 %v3583_v52  ;;  %vm360_vm3 = vcmask 1043456   ;;  %vm2760_vm5 = vcmask 130048   ;;  %s3586_s24 = smov [#allocation2]  }
   0xb   :  { %3119 = vmatprep.subr.bf16.mxu1 %v3580_v15  ;;  %3133 = vmatprep.mubr.msk.bf16.mxu0 %vm3581_vm1, %v3580_v15  ;;  %v48_v54 = vld [vmem:[%s4347_s1] sm:$0x3]  ;;  %s3584_s1 = smov 64   ;;  %s2813_s25 = sshll.u32 %s3586_s24, 4  ;;  %vm2805_vm6 = vcmask 0   ;;  %s2814_s25 = int_to_ptr.vmem [resolvable:$true] %s2813_s25 }
   0xc   :  { %v3693_v25 = vsub.s32 0, %v3690_v24  ;;  %v3703_v30 = vsub.s32 1, %v3690_v24  ;;  %v49_v55 = vsub.f32 1.0, %v48_v54  ;;  %v54_v56 = vunpack.c.0.s8 %v53_v53  ;;  %s3556_s26 = scalar_lea.vmem %s2814_s25, 16  ;;  %s3560_s27 = scalar_lea.vmem %s2814_s25, 32 }
   0xd   :  { %p3557_p0 = scmp.ne.s32.totalorder %s2814_s25, %s3556_s26  ;;  %p3561_p1 = scmp.lt.s32.totalorder %s2814_s25, %s2814_s25 }
   0xe   :  { %3120 = vmatpush3.bf16.msra.mxu1 %v3407_v16  ;;  %v154_v29 = vrot.slane %v3698_v26, %v3693_v25  ;;  %v160_v34 = vrot.slane %v3698_v26, %v3703_v30  ;;  %v50_v57 = vmul.f32 -1e+09, %v49_v55  ;;  %v57_v58 = vsub.s32 %v54_v56, %v3690_v24  ;;  %p3562_p2 = scmp.lt.s32.totalorder %s3560_s27, %s3556_s26 }
   0xf   :  { %3125 = vmatprep.subr.bf16.mxu1 %v3580_v15  ;;  %v3770_v56 = vsub.s32 2, %v3690_v24 }
  0x10   :  { %v58_v59 = vrot.slane %v50_v57, %v57_v58  ;;  %p3563_p3 = por %p3562_p2, %p3561_p1 }
  0x11   :  { %v456_v57 = vrot.slane %v3698_v26, %v3770_v56 }
  0x12   :  { %v59_v60 = vcombine.high %v58_v59, %v58_v59  ;;  %v66_v61 = vrot.slane %v58_v59, %v57_v58  ;;  %p3564_p4 = pnand %p3563_p3, %p3557_p0 }
  0x14   :  { %v73_v62 = vrot.slane %v59_v60, %v57_v58  ;;  %v3734_v63 = vrot.slane %v66_v61, %v3693_v25 }
  0x90   :  { %v126_v4 = vpop.xlane.xlu0 %125 }
  0x91   :  { %v131_v5 = vmul.f32 0.03125, %v126_v4 }
  0x93   :  { %v133_v6 = vsub.f32 %v3660_v0, %v131_v5  ;;  %v3737_v5 = vrot.slane %v73_v62, %v3693_v25 }
  0x94   :  { %v129_v7 = vpop.xlane.xlu0 %128 }
  0x95   :  { %v132_v8 = vmul.f32 0.03125, %v129_v7  ;;  %v135_v9 = vmul.f32 %v133_v6, %v133_v6 }
  0x97   :  { %v134_v10 = vsub.f32 %v3665_v1, %v132_v8  ;;  %v137_v11 = vsel %vm123_vm0, %v135_v9, 0.0 }
  0x98   :  { %138 = vadd.xlane.f32.xlu1 %v137_v11 }
  0x99   :  { %v136_v12 = vmul.f32 %v134_v10, %v134_v10 }
  0x9b   :  { %v140_v13 = vsel %vm123_vm0, %v136_v12, 0.0 }
  0x9c   :  { %141 = vadd.xlane.f32.xlu1 %v140_v13 }
 0x125   :  { %v139_v17 = vpop.xlane.xlu1 %138 }
 0x126   :  { %v143_v18 = vmul.f32 0.03125, %v139_v17 }
 0x128   :  { %v145_v19 = vadd.f32 1e-05, %v143_v18 }
 0x129   :  { %v142_v20 = vpop.xlane.xlu1 %141 }
 0x12a   :  { %3464 = vrsqrt.f32 %v145_v19  ;;  %v144_v22 = vmul.f32 0.03125, %v142_v20 }
 0x12c   :  { %v146_v23 = vadd.f32 1e-05, %v144_v22 }
 0x12e   :  { %3466 = vrsqrt.f32 %v146_v23 }
 0x134   :  { %v3465_v27 = vpop.eup %3464 }
 0x135   :  { %v149_v28 = vmul.f32 %v3465_v27, %v133_v6 }
 0x137   :  { %v155_v33 = vmul.f32 %v154_v29, %v149_v28 }
 0x138   :  { %v3467_v31 = vpop.eup %3466 }
 0x139   :  { %v150_v32 = vmul.f32 %v3467_v31, %v134_v10  ;;  %v161_v36 = vadd.f32 %v160_v34, %v155_v33 }
 0x13b   :  { %v156_v35 = vmul.f32 %v154_v29, %v150_v32 }
 0x13d   :  { %v162_v37 = vadd.f32 %v160_v34, %v156_v35 }
 0x13f   :  { %v163_v38 = vpack.c.bf16 %v162_v37, %v161_v36 }
 0x141   :  { %3122 = vmatmul.mubr.msk.bf16.vlgmr.msra.gmra.mrb[0].mxu1 %vm123_vm0, %v163_v38 }
 0x142   :  { %3127 = vmatprep.mubr.msk.bf16.mxu1 %vm3581_vm1, %v3580_v15 }
 0x214   :  { %v219_v40 = vpop.f32.mrb[0].mxu1 }
 0x215   :  { %v220_v41 = vadd.f32 %v2821_v39, %v219_v40  ;;  %v3123_v42 = vpop.f32.mrb[1].mxu1 }
 0x216   :  { %v222_v43 = vpop.f32.mrb[2].mxu1  ;;  %v3408_v42 = vld [vmem:[%s4350_s4] sm:$0xff]  }
 0x217   :  { %v3713_v44 = vpack.c.bf16 %v220_v41, %v220_v41  ;;  %v223_v45 = vadd.f32 %v2821_v39, %v222_v43  ;;  %v3124_v46 = vpop.f32.mrb[3].mxu1 }
 0x218   :  { %v3409_v46 = vld [vmem:[%s4350_s4 + $0x8] sm:$0xff]  }
 0x219   :  { %v227_v47 = vpack.c.bf16 %v223_v45, %v223_v45  ;;  %229 = vrot.lane.b32.xlu0 %v3713_v44, %s3582_s19 }
 0x21b   :  { %278 = vrot.lane.b32.xlu1 %v227_v47, %s3582_s19 }
 0x28b   :  { %v230_v48 = vpop.permute.xlu0 %229 }
 0x28c   :  { %v235_v49 = vsel %vm123_vm0, %v230_v48, 0 }
 0x28d   :  { %3126 = vmatpush3.bf16.xpose.msra.mxu1 %v235_v49  ;;  %v279_v50 = vpop.permute.xlu1 %278 }
 0x28e   :  { %v284_v51 = vsel %vm123_vm0, %v279_v50, 0  ;;  %3137 = vmatprep.subr.bf16.mxu1 %v3580_v15 }
 0x28f   :  { %3132 = vmatpush3.bf16.xpose.msra.mxu0 %v284_v51 }
 0x290   :  { %3143 = vmatprep.subr.bf16.mxu0 %v3580_v15 }
 0x294   :  { %3128 = vmatmul.mubr.msk.bf16.vlgmr.msra.gmra.mrb[4].mxu1 %vm123_vm0, %v3713_v44 }
 0x295   :  { %3139 = vmatprep.mubr.msk.bf16.mxu1 %vm3581_vm1, %v3580_v15 }
 0x296   :  { %3134 = vmatmul.mubr.msk.bf16.vlgmr.msra.gmra.mrb[0].mxu0 %vm123_vm0, %v227_v47 }
 0x297   :  { %3145 = vmatprep.mubr.msk.bf16.mxu0 %vm3581_vm1, %v3580_v15 }
 0x367   :  { %v271_v2 = vpop.f32.mrb[4].mxu1 }
 0x368   :  { %v326_v3 = vmul.f32 0.17677669, %v271_v2  ;;  %v3129_v4 = vpop.f32.mrb[5].mxu1 }
 0x369   :  { %v274_v6 = vpop.f32.mrb[6].mxu1  ;;  %v320_v7 = vpop.f32.mrb[0].mxu0 }
 0x36a   :  { %v327_v8 = vmul.f32 0.17677669, %v320_v7  ;;  %v3130_v9 = vpop.f32.mrb[7].mxu1  ;;  %v3135_v10 = vpop.f32.mrb[1].mxu0  ;;  %v328_v11 = vadd.f32 %v326_v3, %v3734_v63 }
 0x36b   :  { %v323_v12 = vpop.f32.mrb[2].mxu0 }
 0x36c   :  { %v3136_v13 = vpop.f32.mrb[3].mxu0  ;;  %v331_v14 = vsel %vm330_vm2, %v328_v11, -inf  ;;  %v329_v16 = vadd.f32 %v327_v8, %v3737_v5 }
 0x36d   :  { %332 = vmax.xlane.f32.xlu1 %v331_v14 }
 0x36e   :  { %v334_v17 = vsel %vm330_vm2, %v329_v16, -inf }
 0x36f   :  { %335 = vmax.xlane.f32.xlu0 %v334_v17  ;;  %v3410_v17 = vld [vmem:[%s4351_s5] sm:$0xff]  }
 0x3fa   :  { %v333_v18 = vpop.xlane.xlu1 %332 }
 0x3fb   :  { %v337_v19 = vsub.f32 %v328_v11, %v333_v18  ;;  %v3411_v18 = vld [vmem:[%s4351_s5 + $0x8] sm:$0xff]  }
 0x3fc   :  { %v336_v20 = vpop.xlane.xlu0 %335 }
 0x3fd   :  { %v339_v22 = vmul.f32 1.442695, %v337_v19  ;;  %v338_v23 = vsub.f32 %v329_v16, %v336_v20 }
 0x3ff   :  { %3468 = vpow2.f32 %v339_v22  ;;  %v341_v27 = vmul.f32 1.442695, %v338_v23 }
 0x401   :  { %3470 = vpow2.f32 %v341_v27 }
 0x409   :  { %v3469_v28 = vpop.eup %3468 }
 0x40a   :  { %v343_v29 = vsel %vm330_vm2, %v3469_v28, 0.0 }
 0x40b   :  { %v3471_v31 = vpop.eup %3470  ;;  %344 = vadd.xlane.f32.xlu0 %v343_v29  ;;  %v3797_v29 = vsub.s32 3, %v3690_v24 }
 0x40c   :  { %v346_v32 = vsel %vm330_vm2, %v3471_v31, 0.0 }
 0x40d   :  { %347 = vadd.xlane.f32.xlu1 %v346_v32  ;;  %v3802_v32 = vsub.s32 4, %v3690_v24 }
 0x41e   :  { %404 = vrot.lane.b32.xlu1 %v227_v47, %s3584_s1 }
 0x421   :  { %355 = vrot.lane.b32.xlu0 %v3713_v44, %s3584_s1 }
 0x498   :  { %v345_v33 = vpop.xlane.xlu0 %344 }
 0x499   :  { %3472 = vrcp.f32 %v345_v33 }
 0x49a   :  { %v348_v34 = vpop.xlane.xlu1 %347 }
 0x49b   :  { %3474 = vrcp.f32 %v348_v34 }
 0x49c   :  { %v356_v35 = vpop.permute.xlu0 %355 }
 0x49d   :  { %v362_v36 = vsel %vm360_vm3, %v356_v35, 0 }
 0x49e   :  { %3138 = vmatpush3.bf16.msra.mxu1 %v362_v36  ;;  %v405_v37 = vpop.permute.xlu1 %404 }
 0x49f   :  { %v410_v38 = vsel %vm360_vm3, %v405_v37, 0  ;;  %3149 = vmatprep.subr.bf16.mxu1 %v3580_v15 }
 0x4a0   :  { %3144 = vmatpush3.bf16.msra.mxu0 %v410_v38  ;;  %v550_v38 = vrot.slane %v3698_v26, %v3802_v32 }
 0x4a1   :  { %3157 = vmatprep.subr.bf16.mxu0 %v3580_v15 }
 0x4a3   :  { %v3473_v39 = vpop.eup %3472 }
 0x4a4   :  { %v350_v40 = vmul.f32 %v3473_v39, %v3469_v28 }
 0x4a5   :  { %v3475_v41 = vpop.eup %3474 }
 0x4a6   :  { %v352_v43 = vmul.f32 %v3475_v41, %v3471_v31  ;;  %v353_v44 = vpack.c.bf16 %v350_v40, %v350_v40  ;;  %v544_v31 = vrot.slane %v3698_v26, %v3797_v29 }
 0x4a8   :  { %3140 = vmatmul.mubr.msk.bf16.vlgmr.msra.gmra.mrb[8].mxu1 %vm330_vm2, %v353_v44  ;;  %v354_v45 = vpack.c.bf16 %v352_v43, %v352_v43  ;;  %v3412_v43 = vld [vmem:[%s4352_s6] sm:$0xff]   ;;  %v3413_v44 = vld [vmem:[%s4352_s6 + $0x8] sm:$0xff]  }
 0x4a9   :  { %3150 = vmatpush3.bf16.msra.mxu1 %v3408_v42  ;;  %3153 = vmatprep.mubr.msk.bf16.mxu1 %vm3581_vm1, %v3580_v15 }
 0x4aa   :  { %3146 = vmatmul.mubr.msk.bf16.vlgmr.msra.gmra.mrb[4].mxu0 %vm330_vm2, %v354_v45  ;;  %3151 = vmatprep.subr.bf16.mxu1 %v3580_v15  ;;  %v3414_v45 = vld [vmem:[%s4352_s6 + $0x10] sm:$0xff]  }
 0x4ab   :  { %3161 = vmatprep.mubr.msk.bf16.mxu0 %vm3581_vm1, %v3580_v15  ;;  %3158 = vmatpush3.bf16.msra.mxu0 %v3410_v17 }
 0x4ac   :  { %3159 = vmatprep.subr.bf16.mxu0 %v3580_v15 }
 0x4ad   :  { %3152 = vmatpush3.bf16.msra.mxu1 %v3409_v46  ;;  %v3415_v46 = vld [vmem:[%s4352_s6 + $0x18] sm:$0xff]  }
 0x4ae   :  { %3165 = vmatprep.subr.bf16.mxu1 %v3580_v15 }
 0x4af   :  { %3160 = vmatpush3.bf16.msra.mxu0 %v3411_v18 }
 0x4b0   :  { %3185 = vmatprep.subr.bf16.mxu0 %v3580_v15 }
 0x57b   :  { %v398_v47 = vpop.f32.mrb[8].mxu1 }
 0x57c   :  { %v3141_v48 = vpop.f32.mrb[9].mxu1 }
 0x57d   :  { %v401_v49 = vpop.f32.mrb[10].mxu1  ;;  %v446_v50 = vpop.f32.mrb[4].mxu0  ;;  %v3417_v48 = vld [vmem:[%s4352_s6 + $0x28] sm:$0xff]  }
 0x57e   :  { %v452_v51 = vpack.c.bf16 %v446_v50, %v398_v47  ;;  %v3142_v52 = vpop.f32.mrb[11].mxu1  ;;  %v3147_v53 = vpop.f32.mrb[5].mxu0  ;;  %v3416_v47 = vld [vmem:[%s4352_s6 + $0x20] sm:$0xff]   ;;  %v3418_v49 = vld [vmem:[%s4352_s6 + $0x30] sm:$0xff]   ;;  %v3419_v50 = vld [vmem:[%s4352_s6 + $0x38] sm:$0xff]  }
 0x57f   :  { %v449_v54 = vpop.f32.mrb[6].mxu0 }
 0x580   :  { %v3148_v55 = vpop.f32.mrb[7].mxu0  ;;  %3154 = vmatmul.mubr.msk.bf16.vlgmr.msra.gmra.mrb[12].mxu1 %vm123_vm0, %v452_v51  ;;  %v2832_v51 = vld [vmem:[%s4355_s9] ss:$0 sm:$0xff] }
 0x581   :  { %3181 = vmatprep.mubr.msk.bf16.mxu1 %vm3581_vm1, %v3580_v15  ;;  %3166 = vmatpush3.bf16.msra.mxu1 %v3412_v43 }
 0x582   :  { %3167 = vmatprep.subr.bf16.mxu1 %v3580_v15 }
 0x585   :  { %3168 = vmatpush3.bf16.msra.mxu1 %v3413_v44 }
 0x586   :  { %3169 = vmatprep.subr.bf16.mxu1 %v3580_v15 }
 0x589   :  { %3170 = vmatpush3.bf16.msra.mxu1 %v3414_v45  ;;  %v3420_v45 = vld [vmem:[%s4349_s3 + $0x10] sm:$0xff]  }
 0x58a   :  { %3171 = vmatprep.subr.bf16.mxu1 %v3580_v15 }
 0x58d   :  { %3172 = vmatpush3.bf16.msra.mxu1 %v3415_v46  ;;  %v3421_v46 = vld [vmem:[%s4349_s3 + $0x18] sm:$0xff]  }
 0x58e   :  { %3173 = vmatprep.subr.bf16.mxu1 %v3580_v15 }
 0x591   :  { %3174 = vmatpush3.bf16.msra.mxu1 %v3416_v47 }
 0x592   :  { %3175 = vmatprep.subr.bf16.mxu1 %v3580_v15 }
 0x595   :  { %3176 = vmatpush3.bf16.msra.mxu1 %v3417_v48 }
 0x596   :  { %3177 = vmatprep.subr.bf16.mxu1 %v3580_v15 }
 0x599   :  { %3178 = vmatpush3.bf16.msra.mxu1 %v3418_v49 }
 0x59a   :  { %3179 = vmatprep.subr.bf16.mxu1 %v3580_v15 }
 0x59d   :  { %3180 = vmatpush3.bf16.msra.mxu1 %v3419_v50 }
 0x59e   :  { %3211 = vmatprep.subr.bf16.mxu1 %v3580_v15 }
 0x653   :  { %v506_v58 = vpop.f32.mrb[12].mxu1 }
 0x654   :  { %v507_v59 = vadd.f32 %v506_v58, %v456_v57  ;;  %v3155_v60 = vpop.f32.mrb[13].mxu1 }
 0x655   :  { %v509_v61 = vpop.f32.mrb[14].mxu1 }
 0x656   :  { %v3775_v62 = vadd.f32 %v507_v59, %v3660_v0  ;;  %v510_v2 = vadd.f32 %v509_v61, %v456_v57  ;;  %v3156_v3 = vpop.f32.mrb[15].mxu1 }
 0x658   :  { %v3778_v4 = vadd.f32 %v510_v2, %v3665_v1  ;;  %v515_v6 = vsel %vm123_vm0, %v3775_v62, 0.0 }
 0x659   :  { %516 = vadd.xlane.f32.xlu1 %v515_v6 }
 0x65a   :  { %v518_v7 = vsel %vm123_vm0, %v3778_v4, 0.0 }
 0x65b   :  { %519 = vadd.xlane.f32.xlu0 %v518_v7 }
 0x6e6   :  { %v517_v8 = vpop.xlane.xlu1 %516 }
 0x6e7   :  { %v521_v9 = vmul.f32 0.03125, %v517_v8 }
 0x6e8   :  { %v520_v10 = vpop.xlane.xlu0 %519 }
 0x6e9   :  { %v523_v11 = vsub.f32 %v3775_v62, %v521_v9  ;;  %v522_v0 = vmul.f32 0.03125, %v520_v10 }
 0x6eb   :  { %v524_v12 = vsub.f32 %v3778_v4, %v522_v0  ;;  %v525_v13 = vmul.f32 %v523_v11, %v523_v11 }
 0x6ed   :  { %v527_v1 = vsel %vm123_vm0, %v525_v13, 0.0  ;;  %v526_v14 = vmul.f32 %v524_v12, %v524_v12 }
 0x6ee   :  { %528 = vadd.xlane.f32.xlu0 %v527_v1 }
 0x6ef   :  { %v530_v16 = vsel %vm123_vm0, %v526_v14, 0.0 }
 0x6f0   :  { %531 = vadd.xlane.f32.xlu1 %v530_v16 }
 0x77b   :  { %v529_v19 = vpop.xlane.xlu0 %528 }
 0x77c   :  { %v533_v20 = vmul.f32 0.03125, %v529_v19  ;;  %v3847_v19 = vsub.s32 5, %v3690_v24 }
 0x77d   :  { %v532_v22 = vpop.xlane.xlu1 %531 }
 0x77e   :  { %v535_v23 = vadd.f32 1e-05, %v533_v20  ;;  %v534_v27 = vmul.f32 0.03125, %v532_v22  ;;  %v638_v20 = vrot.slane %v3698_v26, %v3847_v19 }
 0x780   :  { %3476 = vrsqrt.f32 %v535_v23  ;;  %v536_v28 = vadd.f32 1e-05, %v534_v27 }
 0x782   :  { %3478 = vrsqrt.f32 %v536_v28 }
 0x78a   :  { %v3477_v33 = vpop.eup %3476 }
 0x78b   :  { %v539_v34 = vmul.f32 %v3477_v33, %v523_v11 }
 0x78c   :  { %v3479_v35 = vpop.eup %3478 }
 0x78d   :  { %v545_v36 = vmul.f32 %v544_v31, %v539_v34  ;;  %v540_v37 = vmul.f32 %v3479_v35, %v524_v12 }
 0x78f   :  { %v546_v39 = vmul.f32 %v544_v31, %v540_v37  ;;  %v551_v40 = vadd.f32 %v550_v38, %v545_v36 }
 0x791   :  { %v552_v41 = vadd.f32 %v550_v38, %v546_v39 }
 0x793   :  { %v553_v42 = vpack.c.bf16 %v552_v41, %v551_v40 }
 0x795   :  { %3162 = vmatmul.mubr.msk.bf16.vlgmr.msra.gmra.mrb[8].mxu0 %vm123_vm0, %v553_v42 }
 0x796   :  { %3189 = vmatprep.mubr.msk.bf16.mxu0 %vm3581_vm1, %v3580_v15  ;;  %3186 = vmatpush3.bf16.msra.mxu0 %v3420_v45 }
 0x797   :  { %3187 = vmatprep.subr.bf16.mxu0 %v3580_v15 }
 0x79a   :  { %3188 = vmatpush3.bf16.msra.mxu0 %v3421_v46 }
 0x79b   :  { %3193 = vmatprep.subr.bf16.mxu0 %v3580_v15 }
 0x868   :  { %v609_v52 = vpop.f32.mrb[8].mxu0 }
 0x869   :  { %v610_v53 = vadd.f32 %v2832_v51, %v609_v52  ;;  %v3163_v54 = vpop.f32.mrb[9].mxu0 }
 0x86a   :  { %v612_v55 = vpop.f32.mrb[10].mxu0 }
 0x86b   :  { %v616_v57 = vmul.f32 %v610_v53, %v610_v53  ;;  %v613_v58 = vadd.f32 %v2832_v51, %v612_v55  ;;  %v3164_v59 = vpop.f32.mrb[11].mxu0 }
 0x86d   :  { %v618_v60 = vmul.f32 %v616_v57, %v610_v53  ;;  %v617_v61 = vmul.f32 %v613_v58, %v613_v58 }
 0x86f   :  { %v620_v2 = vmul.f32 0.044715, %v618_v60  ;;  %v619_v3 = vmul.f32 %v617_v61, %v613_v58 }
 0x871   :  { %v622_v6 = vadd.f32 %v620_v2, %v610_v53  ;;  %v621_v7 = vmul.f32 0.044715, %v619_v3 }
 0x873   :  { %v624_v8 = vmul.f32 0.7978846, %v622_v6  ;;  %v623_v9 = vadd.f32 %v621_v7, %v613_v58 }
 0x875   :  { %3480 = vtanh.f32 %v624_v8  ;;  %v625_v10 = vmul.f32 0.7978846, %v623_v9  ;;  %v2875_v8 = vld [vmem:[%s4354_s8 + $0x1] ss:$0 sm:$0xff] }
 0x877   :  { %3482 = vtanh.f32 %v625_v10 }
 0x87f   :  { %v3481_v11 = vpop.eup %3480 }
 0x880   :  { %v628_v0 = vadd.f32 1.0, %v3481_v11 }
 0x881   :  { %v3483_v12 = vpop.eup %3482 }
 0x882   :  { %v630_v13 = vmul.f32 0.5, %v628_v0  ;;  %v629_v1 = vadd.f32 1.0, %v3483_v12 }
 0x884   :  { %v631_v14 = vmul.f32 0.5, %v629_v1  ;;  %v632_v16 = vmul.f32 %v630_v13, %v610_v53  ;;  %v3876_v53 = vld [vmem:[%s4353_s7 + $0x8] sm:$0x3f] }
 0x885   :  { %v797_v54 = vrot.slane %v3876_v53, %v3693_v25  ;;  %v803_v61 = vrot.slane %v3876_v53, %v3703_v30 }
 0x886   :  { %v633_v17 = vmul.f32 %v631_v14, %v613_v58 }
 0x888   :  { %v634_v18 = vpack.c.bf16 %v633_v17, %v632_v16 }
 0x88a   :  { %3182 = vmatmul.mubr.bf16.vlgmr.msra.gmra.mrb[16].mxu1 %v634_v18 }
 0x88b   :  { %3213 = vmatprep.mubr.msk.bf16.mxu1 %vm3581_vm1, %v3580_v15 }
 0x95d   :  { %v721_v22 = vpop.f32.mrb[16].mxu1 }
 0x95e   :  { %v722_v23 = vadd.f32 %v721_v22, %v638_v20  ;;  %v3183_v27 = vpop.f32.mrb[17].mxu1 }
 0x95f   :  { %v724_v28 = vpop.f32.mrb[18].mxu1 }
 0x960   :  { %v3852_v31 = vadd.f32 %v722_v23, %v3775_v62  ;;  %v725_v33 = vadd.f32 %v724_v28, %v638_v20  ;;  %v3184_v34 = vpop.f32.mrb[19].mxu1 }
 0x962   :  { %v3855_v35 = vadd.f32 %v725_v33, %v3778_v4  ;;  %v768_v36 = vsel %vm123_vm0, %v3852_v31, 0.0 }
 0x963   :  { %769 = vadd.xlane.f32.xlu0 %v768_v36 }
 0x964   :  { %v771_v37 = vsel %vm123_vm0, %v3855_v35, 0.0 }
 0x965   :  { %772 = vadd.xlane.f32.xlu1 %v771_v37 }
 0x9f0   :  { %v770_v26 = vpop.xlane.xlu0 %769 }
 0x9f1   :  { %v774_v38 = vmul.f32 0.03125, %v770_v26 }
 0x9f2   :  { %v773_v39 = vpop.xlane.xlu1 %772 }
 0x9f3   :  { %v776_v40 = vsub.f32 %v3852_v31, %v774_v38  ;;  %v775_v62 = vmul.f32 0.03125, %v773_v39 }
 0x9f5   :  { %v777_v41 = vsub.f32 %v3855_v35, %v775_v62  ;;  %v778_v42 = vmul.f32 %v776_v40, %v776_v40 }
 0x9f7   :  { %v780_v4 = vsel %vm123_vm0, %v778_v42, 0.0  ;;  %v779_v43 = vmul.f32 %v777_v41, %v777_v41 }
 0x9f8   :  { %781 = vadd.xlane.f32.xlu0 %v780_v4 }
 0x9f9   :  { %v783_v44 = vsel %vm123_vm0, %v779_v43, 0.0 }
 0x9fa   :  { %784 = vadd.xlane.f32.xlu1 %v783_v44 }
 0xa85   :  { %v782_v47 = vpop.xlane.xlu0 %781 }
 0xa86   :  { %v786_v48 = vmul.f32 0.03125, %v782_v47 }
 0xa87   :  { %v785_v49 = vpop.xlane.xlu1 %784 }
 0xa88   :  { %v788_v50 = vadd.f32 1e-05, %v786_v48  ;;  %v787_v51 = vmul.f32 0.03125, %v785_v49 }
 0xa8a   :  { %3484 = vrsqrt.f32 %v788_v50  ;;  %v789_v52 = vadd.f32 1e-05, %v787_v51 }
 0xa8c   :  { %3486 = vrsqrt.f32 %v789_v52 }
 0xa94   :  { %v3485_v55 = vpop.eup %3484 }
 0xa95   :  { %v792_v57 = vmul.f32 %v3485_v55, %v776_v40 }
 0xa96   :  { %v3487_v58 = vpop.eup %3486 }
 0xa97   :  { %v798_v59 = vmul.f32 %v797_v54, %v792_v57  ;;  %v793_v60 = vmul.f32 %v3487_v58, %v777_v41 }
 0xa99   :  { %v799_v2 = vmul.f32 %v797_v54, %v793_v60  ;;  %v804_v3 = vadd.f32 %v803_v61, %v798_v59 }
 0xa9b   :  { %v805_v6 = vadd.f32 %v803_v61, %v799_v2 }
 0xa9d   :  { %v806_v7 = vpack.c.bf16 %v805_v6, %v804_v3 }
 0xa9f   :  { %3190 = vmatmul.mubr.msk.bf16.vlgmr.msra.gmra.mrb[12].mxu0 %vm123_vm0, %v806_v7  ;;  %v3422_v7 = vld [vmem:[%s4350_s4 + $0x10] sm:$0xff]  }
 0xaa0   :  { %3195 = vmatprep.mubr.msk.bf16.mxu0 %vm3581_vm1, %v3580_v15 }
 0xb72   :  { %v862_v9 = vpop.f32.mrb[12].mxu0 }
 0xb73   :  { %v863_v10 = vadd.f32 %v2875_v8, %v862_v9  ;;  %v3191_v11 = vpop.f32.mrb[13].mxu0 }
 0xb74   :  { %v865_v0 = vpop.f32.mrb[14].mxu0 }
 0xb75   :  { %v869_v12 = vpack.c.bf16 %v863_v10, %v863_v10  ;;  %v866_v13 = vadd.f32 %v2875_v8, %v865_v0  ;;  %v3192_v1 = vpop.f32.mrb[15].mxu0  ;;  %v3423_v8 = vld [vmem:[%s4350_s4 + $0x18] sm:$0xff]  }
 0xb77   :  { %v870_v14 = vpack.c.bf16 %v866_v13, %v866_v13  ;;  %872 = vrot.lane.b32.xlu0 %v869_v12, %s3582_s19 }
 0xb79   :  { %921 = vrot.lane.b32.xlu1 %v870_v14, %s3582_s19 }
 0xbe9   :  { %v873_v16 = vpop.permute.xlu0 %872 }
 0xbea   :  { %v878_v17 = vsel %vm123_vm0, %v873_v16, 0 }
 0xbeb   :  { %3194 = vmatpush3.bf16.xpose.msra.mxu0 %v878_v17  ;;  %v922_v18 = vpop.permute.xlu1 %921  ;;  %v1097_v17 = vrot.slane %v3876_v53, %v3770_v56 }
 0xbec   :  { %3199 = vmatprep.subr.bf16.mxu0 %v3580_v15  ;;  %v927_v20 = vsel %vm123_vm0, %v922_v18, 0 }
 0xbf2   :  { %3196 = vmatmul.mubr.msk.bf16.vlgmr.msra.gmra.mrb[16].mxu0 %vm123_vm0, %v869_v12 }
 0xbf3   :  { %3200 = vmatpush3.bf16.xpose.msra.mxu0 %v927_v20  ;;  %3201 = vmatprep.mubr.msk.bf16.mxu0 %vm3581_vm1, %v3580_v15 }
 0xbf4   :  { %3205 = vmatprep.subr.bf16.mxu0 %v3580_v15 }
 0xbfa   :  { %3202 = vmatmul.mubr.msk.bf16.vlgmr.msra.gmra.mrb[20].mxu0 %vm123_vm0, %v870_v14 }
 0xbfb   :  { %3207 = vmatprep.mubr.msk.bf16.mxu0 %vm3581_vm1, %v3580_v15 }
 0xcc5   :  { %v914_v22 = vpop.f32.mrb[16].mxu0 }
 0xcc6   :  { %v969_v23 = vmul.f32 0.17677669, %v914_v22  ;;  %v3197_v27 = vpop.f32.mrb[17].mxu0 }
 0xcc7   :  { %v917_v28 = vpop.f32.mrb[18].mxu0 }
 0xcc8   :  { %v3198_v33 = vpop.f32.mrb[19].mxu0  ;;  %v971_v34 = vadd.f32 %v969_v23, %v3734_v63 }
 0xcca   :  { %v973_v36 = vsel %vm330_vm2, %v971_v34, -inf }
 0xccb   :  { %974 = vmax.xlane.f32.xlu1 %v973_v36 }
 0xccd   :  { %v963_v37 = vpop.f32.mrb[20].mxu0 }
 0xcce   :  { %v970_v26 = vmul.f32 0.17677669, %v963_v37  ;;  %v3203_v38 = vpop.f32.mrb[21].mxu0 }
 0xccf   :  { %v966_v39 = vpop.f32.mrb[22].mxu0 }
 0xcd0   :  { %v3204_v40 = vpop.f32.mrb[23].mxu0  ;;  %v972_v62 = vadd.f32 %v970_v26, %v3737_v5 }
 0xcd2   :  { %v976_v41 = vsel %vm330_vm2, %v972_v62, -inf }
 0xcd3   :  { %977 = vmax.xlane.f32.xlu0 %v976_v41 }
 0xd58   :  { %v975_v42 = vpop.xlane.xlu1 %974 }
 0xd59   :  { %v979_v4 = vsub.f32 %v971_v34, %v975_v42 }
 0xd5b   :  { %v981_v43 = vmul.f32 1.442695, %v979_v4 }
 0xd5d   :  { %3488 = vpow2.f32 %v981_v43  ;;  %v3424_v43 = vld [vmem:[%s4351_s5 + $0x10] sm:$0xff]  }
 0xd60   :  { %v978_v44 = vpop.xlane.xlu0 %977 }
 0xd61   :  { %v980_v45 = vsub.f32 %v972_v62, %v978_v44  ;;  %v3425_v44 = vld [vmem:[%s4351_s5 + $0x18] sm:$0xff]  }
 0xd63   :  { %v983_v46 = vmul.f32 1.442695, %v980_v45 }
 0xd65   :  { %3490 = vpow2.f32 %v983_v46 }
 0xd67   :  { %v3489_v47 = vpop.eup %3488 }
 0xd68   :  { %v985_v48 = vsel %vm330_vm2, %v3489_v47, 0.0 }
 0xd69   :  { %986 = vadd.xlane.f32.xlu0 %v985_v48 }
 0xd6f   :  { %v3491_v49 = vpop.eup %3490 }
 0xd70   :  { %v988_v50 = vsel %vm330_vm2, %v3491_v49, 0.0 }
 0xd71   :  { %989 = vadd.xlane.f32.xlu1 %v988_v50 }
 0xd7f   :  { %997 = vrot.lane.b32.xlu0 %v869_v12, %s3584_s1 }
 0xd82   :  { %1045 = vrot.lane.b32.xlu1 %v870_v14, %s3584_s1 }
 0xdf6   :  { %v987_v51 = vpop.xlane.xlu0 %986 }
 0xdf7   :  { %3492 = vrcp.f32 %v987_v51  ;;  %v1185_v51 = vrot.slane %v3876_v53, %v3797_v29 }
 0xdfa   :  { %v998_v52 = vpop.permute.xlu0 %997 }
 0xdfb   :  { %v1003_v54 = vsel %vm360_vm3, %v998_v52, 0 }
 0xdfc   :  { %3206 = vmatpush3.bf16.msra.mxu0 %v1003_v54 }
 0xdfd   :  { %3217 = vmatprep.subr.bf16.mxu0 %v3580_v15 }
 0xdfe   :  { %v990_v55 = vpop.xlane.xlu1 %989 }
 0xdff   :  { %3494 = vrcp.f32 %v990_v55 }
 0xe01   :  { %v3493_v57 = vpop.eup %3492 }
 0xe02   :  { %v992_v58 = vmul.f32 %v3493_v57, %v3489_v47  ;;  %v1046_v59 = vpop.permute.xlu1 %1045 }
 0xe03   :  { %v1051_v60 = vsel %vm360_vm3, %v1046_v59, 0  ;;  %v1191_v59 = vrot.slane %v3876_v53, %v3802_v32 }
 0xe04   :  { %3212 = vmatpush3.bf16.msra.mxu1 %v1051_v60  ;;  %v995_v61 = vpack.c.bf16 %v992_v58, %v992_v58 }
 0xe05   :  { %3225 = vmatprep.subr.bf16.mxu1 %v3580_v15 }
 0xe06   :  { %3208 = vmatmul.mubr.msk.bf16.vlgmr.msra.gmra.mrb[24].mxu0 %vm330_vm2, %v995_v61 }
 0xe07   :  { %3221 = vmatprep.mubr.msk.bf16.mxu0 %vm3581_vm1, %v3580_v15  ;;  %3218 = vmatpush3.bf16.msra.mxu0 %v3422_v7  ;;  %v3427_v7 = vld [vmem:[%s4352_s6 + $0x48] sm:$0xff]  }
 0xe08   :  { %3219 = vmatprep.subr.bf16.mxu0 %v3580_v15 }
 0xe09   :  { %v3495_v2 = vpop.eup %3494 }
 0xe0a   :  { %v994_v3 = vmul.f32 %v3495_v2, %v3491_v49 }
 0xe0b   :  { %3220 = vmatpush3.bf16.msra.mxu0 %v3423_v8  ;;  %v3428_v8 = vld [vmem:[%s4352_s6 + $0x50] sm:$0xff]  }
 0xe0c   :  { %v996_v6 = vpack.c.bf16 %v994_v3, %v994_v3  ;;  %3233 = vmatprep.subr.bf16.mxu0 %v3580_v15 }
 0xe0e   :  { %3214 = vmatmul.mubr.msk.bf16.vlgmr.msra.gmra.mrb[20].mxu1 %vm330_vm2, %v996_v6  ;;  %v3426_v6 = vld [vmem:[%s4352_s6 + $0x40] sm:$0xff]  }
 0xe0f   :  { %3229 = vmatprep.mubr.msk.bf16.mxu1 %vm3581_vm1, %v3580_v15  ;;  %3226 = vmatpush3.bf16.msra.mxu1 %v3424_v43 }
 0xe10   :  { %3227 = vmatprep.subr.bf16.mxu1 %v3580_v15 }
 0xe13   :  { %3228 = vmatpush3.bf16.msra.mxu1 %v3425_v44 }
 0xe14   :  { %3253 = vmatprep.subr.bf16.mxu1 %v3580_v15 }
 0xed9   :  { %v1039_v9 = vpop.f32.mrb[24].mxu0 }
 0xeda   :  { %v3209_v10 = vpop.f32.mrb[25].mxu0 }
 0xedb   :  { %v1042_v11 = vpop.f32.mrb[26].mxu0  ;;  %v3430_v10 = vld [vmem:[%s4352_s6 + $0x60] sm:$0xff]  }
 0xedc   :  { %v3210_v0 = vpop.f32.mrb[27].mxu0  ;;  %v3431_v11 = vld [vmem:[%s4352_s6 + $0x68] sm:$0xff]  }
 0xedd   :  { %v3432_v0 = vld [vmem:[%s4352_s6 + $0x70] sm:$0xff]  }
 0xee1   :  { %v1087_v12 = vpop.f32.mrb[20].mxu1 }
 0xee2   :  { %v1093_v13 = vpack.c.bf16 %v1087_v12, %v1039_v9  ;;  %v3215_v1 = vpop.f32.mrb[21].mxu1  ;;  %v3429_v9 = vld [vmem:[%s4352_s6 + $0x58] sm:$0xff]  }
 0xee3   :  { %v1090_v14 = vpop.f32.mrb[22].mxu1  ;;  %v3433_v12 = vld [vmem:[%s4352_s6 + $0x78] sm:$0xff]  }
 0xee4   :  { %v3216_v16 = vpop.f32.mrb[23].mxu1  ;;  %3222 = vmatmul.mubr.msk.bf16.vlgmr.msra.gmra.mrb[28].mxu0 %vm123_vm0, %v1093_v13  ;;  %v2886_v13 = vld [vmem:[%s4355_s9 + $0x1] ss:$0 sm:$0xff] }
 0xee5   :  { %3249 = vmatprep.mubr.msk.bf16.mxu0 %vm3581_vm1, %v3580_v15  ;;  %3234 = vmatpush3.bf16.msra.mxu0 %v3426_v6 }
 0xee6   :  { %3235 = vmatprep.subr.bf16.mxu0 %v3580_v15 }
 0xee9   :  { %3236 = vmatpush3.bf16.msra.mxu0 %v3427_v7 }
 0xeea   :  { %3237 = vmatprep.subr.bf16.mxu0 %v3580_v15 }
 0xeed   :  { %3238 = vmatpush3.bf16.msra.mxu0 %v3428_v8  ;;  %v3434_v8 = vld [vmem:[%s4349_s3 + $0x20] sm:$0xff]  }
 0xeee   :  { %3239 = vmatprep.subr.bf16.mxu0 %v3580_v15 }
 0xef1   :  { %3240 = vmatpush3.bf16.msra.mxu0 %v3429_v9  ;;  %v3435_v9 = vld [vmem:[%s4349_s3 + $0x28] sm:$0xff]  }
 0xef2   :  { %3241 = vmatprep.subr.bf16.mxu0 %v3580_v15 }
 0xef5   :  { %3242 = vmatpush3.bf16.msra.mxu0 %v3430_v10 }
 0xef6   :  { %3243 = vmatprep.subr.bf16.mxu0 %v3580_v15 }
 0xef9   :  { %3244 = vmatpush3.bf16.msra.mxu0 %v3431_v11 }
 0xefa   :  { %3245 = vmatprep.subr.bf16.mxu0 %v3580_v15 }
 0xefd   :  { %3246 = vmatpush3.bf16.msra.mxu0 %v3432_v0 }
 0xefe   :  { %3247 = vmatprep.subr.bf16.mxu0 %v3580_v15 }
 0xf01   :  { %3248 = vmatpush3.bf16.msra.mxu0 %v3433_v12 }
 0xf02   :  { %3279 = vmatprep.subr.bf16.mxu0 %v3580_v15 }
 0xfb7   :  { %v1147_v18 = vpop.f32.mrb[28].mxu0 }
 0xfb8   :  { %v1148_v20 = vadd.f32 %v1147_v18, %v1097_v17  ;;  %v3223_v22 = vpop.f32.mrb[29].mxu0 }
 0xfb9   :  { %v1150_v23 = vpop.f32.mrb[30].mxu0 }
 0xfba   :  { %v3932_v27 = vadd.f32 %v1148_v20, %v3852_v31  ;;  %v1151_v28 = vadd.f32 %v1150_v23, %v1097_v17  ;;  %v3224_v33 = vpop.f32.mrb[31].mxu0 }
 0xfbc   :  { %v3935_v34 = vadd.f32 %v1151_v28, %v3855_v35  ;;  %v1156_v36 = vsel %vm123_vm0, %v3932_v27, 0.0 }
 0xfbd   :  { %1157 = vadd.xlane.f32.xlu1 %v1156_v36 }
 0xfbe   :  { %v1159_v37 = vsel %vm123_vm0, %v3935_v34, 0.0 }
 0xfbf   :  { %1160 = vadd.xlane.f32.xlu0 %v1159_v37 }
0x104a   :  { %v1158_v26 = vpop.xlane.xlu1 %1157 }
0x104b   :  { %v1162_v38 = vmul.f32 0.03125, %v1158_v26 }
0x104c   :  { %v1161_v39 = vpop.xlane.xlu0 %1160 }
0x104d   :  { %v1164_v40 = vsub.f32 %v3932_v27, %v1162_v38  ;;  %v1163_v31 = vmul.f32 0.03125, %v1161_v39 }
0x104f   :  { %v1165_v62 = vsub.f32 %v3935_v34, %v1163_v31  ;;  %v1166_v41 = vmul.f32 %v1164_v40, %v1164_v40 }
0x1051   :  { %v1168_v35 = vsel %vm123_vm0, %v1166_v41, 0.0  ;;  %v1167_v42 = vmul.f32 %v1165_v62, %v1165_v62 }
0x1052   :  { %1169 = vadd.xlane.f32.xlu0 %v1168_v35 }
0x1053   :  { %v1171_v4 = vsel %vm123_vm0, %v1167_v42, 0.0 }
0x1054   :  { %1172 = vadd.xlane.f32.xlu1 %v1171_v4 }
0x10df   :  { %v1170_v45 = vpop.xlane.xlu0 %1169 }
0x10e0   :  { %v1174_v46 = vmul.f32 0.03125, %v1170_v45 }
0x10e1   :  { %v1173_v47 = vpop.xlane.xlu1 %1172 }
0x10e2   :  { %v1176_v48 = vadd.f32 1e-05, %v1174_v46  ;;  %v1175_v49 = vmul.f32 0.03125, %v1173_v47  ;;  %v1279_v46 = vrot.slane %v3876_v53, %v3847_v19 }
0x10e4   :  { %3496 = vrsqrt.f32 %v1176_v48  ;;  %v1177_v50 = vadd.f32 1e-05, %v1175_v49 }
0x10e6   :  { %3498 = vrsqrt.f32 %v1177_v50 }
0x10ee   :  { %v3497_v52 = vpop.eup %3496 }
0x10ef   :  { %v1180_v54 = vmul.f32 %v3497_v52, %v1164_v40 }
0x10f0   :  { %v3499_v55 = vpop.eup %3498 }
0x10f1   :  { %v1186_v57 = vmul.f32 %v1185_v51, %v1180_v54  ;;  %v1181_v58 = vmul.f32 %v3499_v55, %v1165_v62 }
0x10f3   :  { %v1187_v60 = vmul.f32 %v1185_v51, %v1181_v58  ;;  %v1192_v61 = vadd.f32 %v1191_v59, %v1186_v57 }
0x10f5   :  { %v1193_v2 = vadd.f32 %v1191_v59, %v1187_v60 }
0x10f7   :  { %v1194_v3 = vpack.c.bf16 %v1193_v2, %v1192_v61 }
0x10f9   :  { %3230 = vmatmul.mubr.msk.bf16.vlgmr.msra.gmra.mrb[24].mxu1 %vm123_vm0, %v1194_v3 }
0x10fa   :  { %3257 = vmatprep.mubr.msk.bf16.mxu1 %vm3581_vm1, %v3580_v15  ;;  %3254 = vmatpush3.bf16.msra.mxu1 %v3434_v8 }
0x10fb   :  { %3255 = vmatprep.subr.bf16.mxu1 %v3580_v15 }
0x10fe   :  { %3256 = vmatpush3.bf16.msra.mxu1 %v3435_v9 }
0x10ff   :  { %3261 = vmatprep.subr.bf16.mxu1 %v3580_v15 }
0x11cc   :  { %v1250_v1 = vpop.f32.mrb[24].mxu1 }
0x11cd   :  { %v1251_v14 = vadd.f32 %v2886_v13, %v1250_v1  ;;  %v3231_v16 = vpop.f32.mrb[25].mxu1 }
0x11ce   :  { %v1253_v17 = vpop.f32.mrb[26].mxu1 }
0x11cf   :  { %v1257_v18 = vmul.f32 %v1251_v14, %v1251_v14  ;;  %v1254_v20 = vadd.f32 %v2886_v13, %v1253_v17  ;;  %v3232_v22 = vpop.f32.mrb[27].mxu1 }
0x11d1   :  { %v1259_v23 = vmul.f32 %v1257_v18, %v1251_v14  ;;  %v1258_v28 = vmul.f32 %v1254_v20, %v1254_v20 }
0x11d3   :  { %v1261_v33 = vmul.f32 0.044715, %v1259_v23  ;;  %v1260_v36 = vmul.f32 %v1258_v28, %v1254_v20 }
0x11d5   :  { %v1263_v37 = vadd.f32 %v1261_v33, %v1251_v14  ;;  %v1262_v26 = vmul.f32 0.044715, %v1260_v36 }
0x11d7   :  { %v1265_v38 = vmul.f32 0.7978846, %v1263_v37  ;;  %v1264_v39 = vadd.f32 %v1262_v26, %v1254_v20 }
0x11d9   :  { %3500 = vtanh.f32 %v1265_v38  ;;  %v1266_v40 = vmul.f32 0.7978846, %v1264_v39  ;;  %v2929_v38 = vld [vmem:[%s4354_s8 + $0x2] ss:$0 sm:$0xff] }
0x11db   :  { %3502 = vtanh.f32 %v1266_v40 }
0x11e3   :  { %v3501_v31 = vpop.eup %3500 }
0x11e4   :  { %v1269_v62 = vadd.f32 1.0, %v3501_v31 }
0x11e5   :  { %v3503_v41 = vpop.eup %3502 }
0x11e6   :  { %v1271_v35 = vmul.f32 0.5, %v1269_v62  ;;  %v1270_v42 = vadd.f32 1.0, %v3503_v41 }
0x11e8   :  { %v1272_v4 = vmul.f32 0.5, %v1270_v42  ;;  %v1273_v43 = vmul.f32 %v1271_v35, %v1251_v14  ;;  %v4024_v14 = vld [vmem:[%s4353_s7 + $0x10] sm:$0x3f] }
0x11e9   :  { %v1438_v16 = vrot.slane %v4024_v14, %v3693_v25  ;;  %v1444_v28 = vrot.slane %v4024_v14, %v3703_v30 }
0x11ea   :  { %v1274_v44 = vmul.f32 %v1272_v4, %v1254_v20 }
0x11ec   :  { %v1275_v45 = vpack.c.bf16 %v1274_v44, %v1273_v43 }
0x11ee   :  { %3250 = vmatmul.mubr.bf16.vlgmr.msra.gmra.mrb[32].mxu0 %v1275_v45 }
0x11ef   :  { %3281 = vmatprep.mubr.msk.bf16.mxu0 %vm3581_vm1, %v3580_v15 }
0x12c1   :  { %v1362_v47 = vpop.f32.mrb[32].mxu0 }
0x12c2   :  { %v1363_v48 = vadd.f32 %v1362_v47, %v1279_v46  ;;  %v3251_v49 = vpop.f32.mrb[33].mxu0  ;;  %v77_v47 = vand.u32 127, %v55_v21 }
0x12c3   :  { %v1365_v50 = vpop.f32.mrb[34].mxu0 }
0x12c4   :  { %v4000_v51 = vadd.f32 %v1363_v48, %v3932_v27  ;;  %v1366_v52 = vadd.f32 %v1365_v50, %v1279_v46  ;;  %v3252_v54 = vpop.f32.mrb[35].mxu0  ;;  %vm78_vm4 = vcmp.le.s32.totalorder %v77_v47, %v3690_v24  ;;  %v3585_v48 = vmov -1e+09  }
0x12c5   :  { %v79_v49 = vsel %vm78_vm4, 0.0, %v3585_v48 }
0x12c6   :  { %v4003_v55 = vadd.f32 %v1366_v52, %v3935_v34  ;;  %v1409_v57 = vsel %vm123_vm0, %v4000_v51, 0.0  ;;  %v4051_v50 = vadd.f32 %v3734_v63, %v79_v49 }
0x12c7   :  { %1410 = vadd.xlane.f32.xlu0 %v1409_v57 }
0x12c8   :  { %v1412_v58 = vsel %vm123_vm0, %v4003_v55, 0.0 }
0x12c9   :  { %1413 = vadd.xlane.f32.xlu1 %v1412_v58 }
0x1354   :  { %v1411_v53 = vpop.xlane.xlu0 %1410 }
0x1355   :  { %v1415_v59 = vmul.f32 0.03125, %v1411_v53 }
0x1356   :  { %v1414_v60 = vpop.xlane.xlu1 %1413 }
0x1357   :  { %v1417_v61 = vsub.f32 %v4000_v51, %v1415_v59  ;;  %v1416_v27 = vmul.f32 0.03125, %v1414_v60 }
0x1359   :  { %v1418_v2 = vsub.f32 %v4003_v55, %v1416_v27  ;;  %v1419_v3 = vmul.f32 %v1417_v61, %v1417_v61 }
0x135b   :  { %v1421_v34 = vsel %vm123_vm0, %v1419_v3, 0.0  ;;  %v1420_v6 = vmul.f32 %v1418_v2, %v1418_v2 }
0x135c   :  { %1422 = vadd.xlane.f32.xlu0 %v1421_v34 }
0x135d   :  { %v1424_v7 = vsel %vm123_vm0, %v1420_v6, 0.0 }
0x135e   :  { %1425 = vadd.xlane.f32.xlu1 %v1424_v7 }
0x13e9   :  { %v1423_v10 = vpop.xlane.xlu0 %1422 }
0x13ea   :  { %v1427_v11 = vmul.f32 0.03125, %v1423_v10 }
0x13eb   :  { %v1426_v0 = vpop.xlane.xlu1 %1425 }
0x13ec   :  { %v1429_v12 = vadd.f32 1e-05, %v1427_v11  ;;  %v1428_v13 = vmul.f32 0.03125, %v1426_v0 }
0x13ee   :  { %3504 = vrsqrt.f32 %v1429_v12  ;;  %v1430_v1 = vadd.f32 1e-05, %v1428_v13 }
0x13f0   :  { %3506 = vrsqrt.f32 %v1430_v1 }
0x13f8   :  { %v3505_v17 = vpop.eup %3504 }
0x13f9   :  { %v1433_v18 = vmul.f32 %v3505_v17, %v1417_v61  ;;  %v4056_v61 = vadd.f32 %v3737_v5, %v79_v49 }
0x13fa   :  { %v3507_v20 = vpop.eup %3506 }
0x13fb   :  { %v1439_v22 = vmul.f32 %v1438_v16, %v1433_v18  ;;  %v1434_v23 = vmul.f32 %v3507_v20, %v1418_v2 }
0x13fd   :  { %v1440_v33 = vmul.f32 %v1438_v16, %v1434_v23  ;;  %v1445_v36 = vadd.f32 %v1444_v28, %v1439_v22 }
0x13ff   :  { %v1446_v37 = vadd.f32 %v1444_v28, %v1440_v33 }
0x1401   :  { %v1447_v26 = vpack.c.bf16 %v1446_v37, %v1445_v36 }
0x1403   :  { %3258 = vmatmul.mubr.msk.bf16.vlgmr.msra.gmra.mrb[28].mxu1 %vm123_vm0, %v1447_v26 }
0x1404   :  { %3263 = vmatprep.mubr.msk.bf16.mxu1 %vm3581_vm1, %v3580_v15 }
0x14d6   :  { %v1503_v39 = vpop.f32.mrb[28].mxu1 }
0x14d7   :  { %v1504_v40 = vadd.f32 %v2929_v38, %v1503_v39  ;;  %v3259_v31 = vpop.f32.mrb[29].mxu1  ;;  %v3437_v39 = vld [vmem:[%s4350_s4 + $0x28] sm:$0xff]  }
0x14d8   :  { %v1506_v62 = vpop.f32.mrb[30].mxu1 }
0x14d9   :  { %v1510_v41 = vpack.c.bf16 %v1504_v40, %v1504_v40  ;;  %v1507_v35 = vadd.f32 %v2929_v38, %v1506_v62  ;;  %v3260_v42 = vpop.f32.mrb[31].mxu1  ;;  %v3436_v38 = vld [vmem:[%s4350_s4 + $0x20] sm:$0xff]  }
0x14db   :  { %v1511_v4 = vpack.c.bf16 %v1507_v35, %v1507_v35  ;;  %1513 = vrot.lane.b32.xlu0 %v1510_v41, %s3582_s19 }
0x14dd   :  { %1562 = vrot.lane.b32.xlu1 %v1511_v4, %s3582_s19 }
0x154d   :  { %v1514_v43 = vpop.permute.xlu0 %1513 }
0x154e   :  { %v1519_v44 = vsel %vm123_vm0, %v1514_v43, 0 }
0x154f   :  { %3262 = vmatpush3.bf16.xpose.msra.mxu1 %v1519_v44  ;;  %v1563_v45 = vpop.permute.xlu1 %1562 }
0x1550   :  { %3267 = vmatprep.subr.bf16.mxu1 %v3580_v15  ;;  %v1568_v46 = vsel %vm123_vm0, %v1563_v45, 0  ;;  %v1738_v45 = vrot.slane %v4024_v14, %v3770_v56 }
0x1556   :  { %3264 = vmatmul.mubr.msk.bf16.vlgmr.msra.gmra.mrb[32].mxu1 %vm123_vm0, %v1510_v41 }
0x1557   :  { %3268 = vmatpush3.bf16.xpose.msra.mxu1 %v1568_v46  ;;  %3269 = vmatprep.mubr.msk.bf16.mxu1 %vm3581_vm1, %v3580_v15 }
0x1558   :  { %3273 = vmatprep.subr.bf16.mxu1 %v3580_v15 }
0x155e   :  { %3270 = vmatmul.mubr.msk.bf16.vlgmr.msra.gmra.mrb[36].mxu1 %vm123_vm0, %v1511_v4 }
0x155f   :  { %3275 = vmatprep.mubr.msk.bf16.mxu1 %vm3581_vm1, %v3580_v15 }
0x1629   :  { %v1555_v52 = vpop.f32.mrb[32].mxu1 }
0x162a   :  { %v1610_v54 = vmul.f32 0.17677669, %v1555_v52  ;;  %v3265_v57 = vpop.f32.mrb[33].mxu1 }
0x162b   :  { %v1558_v58 = vpop.f32.mrb[34].mxu1 }
0x162c   :  { %v3266_v53 = vpop.f32.mrb[35].mxu1  ;;  %v1612_v59 = vadd.f32 %v1610_v54, %v4051_v50 }
0x162e   :  { %v1614_v60 = vsel %vm330_vm2, %v1612_v59, -inf }
0x162f   :  { %1615 = vmax.xlane.f32.xlu1 %v1614_v60 }
0x1631   :  { %v1604_v21 = vpop.f32.mrb[36].mxu1 }
0x1632   :  { %v1611_v24 = vmul.f32 0.17677669, %v1604_v21  ;;  %v3271_v27 = vpop.f32.mrb[37].mxu1 }
0x1633   :  { %v1607_v2 = vpop.f32.mrb[38].mxu1 }
0x1634   :  { %v3272_v3 = vpop.f32.mrb[39].mxu1  ;;  %v1613_v63 = vadd.f32 %v1611_v24, %v4056_v61 }
0x1636   :  { %v1617_v34 = vsel %vm330_vm2, %v1613_v63, -inf }
0x1637   :  { %1618 = vmax.xlane.f32.xlu0 %v1617_v34 }
0x16bc   :  { %v1616_v6 = vpop.xlane.xlu1 %1615 }
0x16bd   :  { %v1620_v7 = vsub.f32 %v1612_v59, %v1616_v6  ;;  %v3438_v6 = vld [vmem:[%s4351_s5 + $0x20] sm:$0xff]  }
0x16bf   :  { %v1622_v8 = vmul.f32 1.442695, %v1620_v7  ;;  %v3439_v7 = vld [vmem:[%s4351_s5 + $0x28] sm:$0xff]  }
0x16c1   :  { %3508 = vpow2.f32 %v1622_v8 }
0x16c4   :  { %v1619_v9 = vpop.xlane.xlu0 %1618 }
0x16c5   :  { %v1621_v10 = vsub.f32 %v1613_v63, %v1619_v9 }
0x16c7   :  { %v1624_v11 = vmul.f32 1.442695, %v1621_v10 }
0x16c9   :  { %3510 = vpow2.f32 %v1624_v11 }
0x16cb   :  { %v3509_v5 = vpop.eup %3508 }
0x16cc   :  { %v1626_v0 = vsel %vm330_vm2, %v3509_v5, 0.0 }
0x16cd   :  { %1627 = vadd.xlane.f32.xlu0 %v1626_v0 }
0x16d3   :  { %v3511_v12 = vpop.eup %3510 }
0x16d4   :  { %v1629_v13 = vsel %vm330_vm2, %v3511_v12, 0.0 }
0x16d5   :  { %1630 = vadd.xlane.f32.xlu1 %v1629_v13 }
0x16e3   :  { %1638 = vrot.lane.b32.xlu0 %v1510_v41, %s3584_s1 }
0x16e6   :  { %1686 = vrot.lane.b32.xlu1 %v1511_v4, %s3584_s1 }
0x175a   :  { %v1628_v1 = vpop.xlane.xlu0 %1627 }
0x175b   :  { %3512 = vrcp.f32 %v1628_v1 }
0x175e   :  { %v1639_v16 = vpop.permute.xlu0 %1638 }
0x175f   :  { %v1644_v17 = vsel %vm360_vm3, %v1639_v16, 0 }
0x1760   :  { %3274 = vmatpush3.bf16.msra.mxu1 %v1644_v17 }
0x1761   :  { %3285 = vmatprep.subr.bf16.mxu1 %v3580_v15 }
0x1762   :  { %v1631_v18 = vpop.xlane.xlu1 %1630 }
0x1763   :  { %3514 = vrcp.f32 %v1631_v18 }
0x1765   :  { %v3513_v20 = vpop.eup %3512 }
0x1766   :  { %v1633_v22 = vmul.f32 %v3513_v20, %v3509_v5  ;;  %v1687_v23 = vpop.permute.xlu1 %1686  ;;  %v1832_v20 = vrot.slane %v4024_v14, %v3802_v32 }
0x1767   :  { %v1692_v28 = vsel %vm360_vm3, %v1687_v23, 0 }
0x1768   :  { %3280 = vmatpush3.bf16.msra.mxu0 %v1692_v28  ;;  %v1636_v33 = vpack.c.bf16 %v1633_v22, %v1633_v22 }
0x1769   :  { %3293 = vmatprep.subr.bf16.mxu0 %v3580_v15 }
0x176a   :  { %3276 = vmatmul.mubr.msk.bf16.vlgmr.msra.gmra.mrb[40].mxu1 %vm330_vm2, %v1636_v33 }
0x176b   :  { %3289 = vmatprep.mubr.msk.bf16.mxu1 %vm3581_vm1, %v3580_v15  ;;  %3286 = vmatpush3.bf16.msra.mxu1 %v3436_v38  ;;  %v3443_v38 = vld [vmem:[%s4352_s6 + $0x98] sm:$0xff]  }
0x176c   :  { %3287 = vmatprep.subr.bf16.mxu1 %v3580_v15 }
0x176d   :  { %v3515_v36 = vpop.eup %3514 }
0x176e   :  { %v1635_v37 = vmul.f32 %v3515_v36, %v3511_v12  ;;  %v1826_v12 = vrot.slane %v4024_v14, %v3797_v29  ;;  %v3440_v36 = vld [vmem:[%s4352_s6 + $0x80] sm:$0xff]  }
0x176f   :  { %3288 = vmatpush3.bf16.msra.mxu1 %v3437_v39  ;;  %v3444_v39 = vld [vmem:[%s4352_s6 + $0xa0] sm:$0xff]  }
0x1770   :  { %v1637_v26 = vpack.c.bf16 %v1635_v37, %v1635_v37  ;;  %3301 = vmatprep.subr.bf16.mxu1 %v3580_v15  ;;  %v3441_v37 = vld [vmem:[%s4352_s6 + $0x88] sm:$0xff]  }
0x1772   :  { %3282 = vmatmul.mubr.msk.bf16.vlgmr.msra.gmra.mrb[36].mxu0 %vm330_vm2, %v1637_v26  ;;  %v3442_v26 = vld [vmem:[%s4352_s6 + $0x90] sm:$0xff]  }
0x1773   :  { %3297 = vmatprep.mubr.msk.bf16.mxu0 %vm3581_vm1, %v3580_v15  ;;  %3294 = vmatpush3.bf16.msra.mxu0 %v3438_v6 }
0x1774   :  { %3295 = vmatprep.subr.bf16.mxu0 %v3580_v15 }
0x1777   :  { %3296 = vmatpush3.bf16.msra.mxu0 %v3439_v7  ;;  %v1920_v7 = vrot.slane %v4024_v14, %v3847_v19 }
0x1778   :  { %3321 = vmatprep.subr.bf16.mxu0 %v3580_v15 }
0x183d   :  { %v1680_v40 = vpop.f32.mrb[40].mxu1 }
0x183e   :  { %v3277_v31 = vpop.f32.mrb[41].mxu1 }
0x183f   :  { %v1683_v62 = vpop.f32.mrb[42].mxu1  ;;  %v3446_v31 = vld [vmem:[%s4352_s6 + $0xb0] sm:$0xff]  }
0x1840   :  { %v3278_v41 = vpop.f32.mrb[43].mxu1  ;;  %v3447_v62 = vld [vmem:[%s4352_s6 + $0xb8] sm:$0xff]  }
0x1841   :  { %v2940_v41 = vld [vmem:[%s4355_s9 + $0x2] ss:$0 sm:$0xff] }
0x1845   :  { %v1728_v35 = vpop.f32.mrb[36].mxu0 }
0x1846   :  { %v1734_v42 = vpack.c.bf16 %v1728_v35, %v1680_v40  ;;  %v3283_v4 = vpop.f32.mrb[37].mxu0  ;;  %v3445_v40 = vld [vmem:[%s4352_s6 + $0xa8] sm:$0xff]  }
0x1847   :  { %v1731_v43 = vpop.f32.mrb[38].mxu0 }
0x1848   :  { %v3284_v44 = vpop.f32.mrb[39].mxu0  ;;  %3290 = vmatmul.mubr.msk.bf16.vlgmr.msra.gmra.mrb[44].mxu1 %vm123_vm0, %v1734_v42 }
0x1849   :  { %3317 = vmatprep.mubr.msk.bf16.mxu1 %vm3581_vm1, %v3580_v15  ;;  %3302 = vmatpush3.bf16.msra.mxu1 %v3440_v36  ;;  %v3448_v36 = vld [vmem:[%s4349_s3 + $0x30] sm:$0xff]  }
0x184a   :  { %3303 = vmatprep.subr.bf16.mxu1 %v3580_v15 }
0x184d   :  { %3304 = vmatpush3.bf16.msra.mxu1 %v3441_v37  ;;  %v3449_v37 = vld [vmem:[%s4349_s3 + $0x38] sm:$0xff]  }
0x184e   :  { %3305 = vmatprep.subr.bf16.mxu1 %v3580_v15 }
0x1851   :  { %3306 = vmatpush3.bf16.msra.mxu1 %v3442_v26 }
0x1852   :  { %3307 = vmatprep.subr.bf16.mxu1 %v3580_v15 }
0x1855   :  { %3308 = vmatpush3.bf16.msra.mxu1 %v3443_v38 }
0x1856   :  { %3309 = vmatprep.subr.bf16.mxu1 %v3580_v15 }
0x1859   :  { %3310 = vmatpush3.bf16.msra.mxu1 %v3444_v39 }
0x185a   :  { %3311 = vmatprep.subr.bf16.mxu1 %v3580_v15 }
0x185d   :  { %3312 = vmatpush3.bf16.msra.mxu1 %v3445_v40 }
0x185e   :  { %3313 = vmatprep.subr.bf16.mxu1 %v3580_v15 }
0x1861   :  { %3314 = vmatpush3.bf16.msra.mxu1 %v3446_v31 }
0x1862   :  { %3315 = vmatprep.subr.bf16.mxu1 %v3580_v15 }
0x1865   :  { %3316 = vmatpush3.bf16.msra.mxu1 %v3447_v62 }
0x1866   :  { %3347 = vmatprep.subr.bf16.mxu1 %v3580_v15 }
0x191b   :  { %v1788_v46 = vpop.f32.mrb[44].mxu1 }
0x191c   :  { %v1789_v47 = vadd.f32 %v1788_v46, %v1738_v45  ;;  %v3291_v48 = vpop.f32.mrb[45].mxu1 }
0x191d   :  { %v1791_v49 = vpop.f32.mrb[46].mxu1 }
0x191e   :  { %v4088_v52 = vadd.f32 %v1789_v47, %v4000_v51  ;;  %v1792_v54 = vadd.f32 %v1791_v49, %v1738_v45  ;;  %v3292_v57 = vpop.f32.mrb[47].mxu1 }
0x1920   :  { %v4091_v58 = vadd.f32 %v1792_v54, %v4003_v55  ;;  %v1797_v53 = vsel %vm123_vm0, %v4088_v52, 0.0 }
0x1921   :  { %1798 = vadd.xlane.f32.xlu1 %v1797_v53 }
0x1922   :  { %v1800_v59 = vsel %vm123_vm0, %v4091_v58, 0.0 }
0x1923   :  { %1801 = vadd.xlane.f32.xlu0 %v1800_v59 }
0x19ae   :  { %v1799_v60 = vpop.xlane.xlu1 %1798 }
0x19af   :  { %v1803_v21 = vmul.f32 0.03125, %v1799_v60 }
0x19b0   :  { %v1802_v24 = vpop.xlane.xlu0 %1801 }
0x19b1   :  { %v1805_v27 = vsub.f32 %v4088_v52, %v1803_v21  ;;  %v1804_v51 = vmul.f32 0.03125, %v1802_v24 }
0x19b3   :  { %v1806_v2 = vsub.f32 %v4091_v58, %v1804_v51  ;;  %v1807_v3 = vmul.f32 %v1805_v27, %v1805_v27 }
0x19b5   :  { %v1809_v55 = vsel %vm123_vm0, %v1807_v3, 0.0  ;;  %v1808_v63 = vmul.f32 %v1806_v2, %v1806_v2 }
0x19b6   :  { %1810 = vadd.xlane.f32.xlu0 %v1809_v55 }
0x19b7   :  { %v1812_v34 = vsel %vm123_vm0, %v1808_v63, 0.0 }
0x19b8   :  { %1813 = vadd.xlane.f32.xlu1 %v1812_v34 }
0x1a43   :  { %v1811_v8 = vpop.xlane.xlu0 %1810 }
0x1a44   :  { %v1815_v9 = vmul.f32 0.03125, %v1811_v8 }
0x1a45   :  { %v1814_v10 = vpop.xlane.xlu1 %1813 }
0x1a46   :  { %v1817_v11 = vadd.f32 1e-05, %v1815_v9  ;;  %v1816_v5 = vmul.f32 0.03125, %v1814_v10 }
0x1a48   :  { %3516 = vrsqrt.f32 %v1817_v11  ;;  %v1818_v0 = vadd.f32 1e-05, %v1816_v5 }
0x1a4a   :  { %3518 = vrsqrt.f32 %v1818_v0 }
0x1a52   :  { %v3517_v13 = vpop.eup %3516 }
0x1a53   :  { %v1821_v1 = vmul.f32 %v3517_v13, %v1805_v27 }
0x1a54   :  { %v3519_v16 = vpop.eup %3518 }
0x1a55   :  { %v1827_v17 = vmul.f32 %v1826_v12, %v1821_v1  ;;  %v1822_v18 = vmul.f32 %v3519_v16, %v1806_v2 }
0x1a57   :  { %v1828_v22 = vmul.f32 %v1826_v12, %v1822_v18  ;;  %v1833_v23 = vadd.f32 %v1832_v20, %v1827_v17 }
0x1a59   :  { %v1834_v28 = vadd.f32 %v1832_v20, %v1828_v22 }
0x1a5b   :  { %v1835_v33 = vpack.c.bf16 %v1834_v28, %v1833_v23 }
0x1a5d   :  { %3298 = vmatmul.mubr.msk.bf16.vlgmr.msra.gmra.mrb[40].mxu0 %vm123_vm0, %v1835_v33 }
0x1a5e   :  { %3325 = vmatprep.mubr.msk.bf16.mxu0 %vm3581_vm1, %v3580_v15  ;;  %3322 = vmatpush3.bf16.msra.mxu0 %v3448_v36 }
0x1a5f   :  { %3323 = vmatprep.subr.bf16.mxu0 %v3580_v15 }
0x1a62   :  { %3324 = vmatpush3.bf16.msra.mxu0 %v3449_v37 }
0x1a63   :  { %3329 = vmatprep.subr.bf16.mxu0 %v3580_v15 }
0x1b30   :  { %v1891_v35 = vpop.f32.mrb[40].mxu0 }
0x1b31   :  { %v1892_v42 = vadd.f32 %v2940_v41, %v1891_v35  ;;  %v3299_v4 = vpop.f32.mrb[41].mxu0 }
0x1b32   :  { %v1894_v43 = vpop.f32.mrb[42].mxu0 }
0x1b33   :  { %v1898_v44 = vmul.f32 %v1892_v42, %v1892_v42  ;;  %v1895_v45 = vadd.f32 %v2940_v41, %v1894_v43  ;;  %v3300_v46 = vpop.f32.mrb[43].mxu0  ;;  %v4180_v41 = vld [vmem:[%s4353_s7 + $0x18] sm:$0x3f] }
0x1b34   :  { %v2079_v35 = vrot.slane %v4180_v41, %v3693_v25  ;;  %v2085_v46 = vrot.slane %v4180_v41, %v3703_v30 }
0x1b35   :  { %v1900_v47 = vmul.f32 %v1898_v44, %v1892_v42  ;;  %v1899_v48 = vmul.f32 %v1895_v45, %v1895_v45 }
0x1b37   :  { %v1902_v49 = vmul.f32 0.044715, %v1900_v47  ;;  %v1901_v54 = vmul.f32 %v1899_v48, %v1895_v45 }
0x1b39   :  { %v1904_v57 = vadd.f32 %v1902_v49, %v1892_v42  ;;  %v1903_v53 = vmul.f32 0.044715, %v1901_v54 }
0x1b3b   :  { %v1906_v59 = vmul.f32 0.7978846, %v1904_v57  ;;  %v1905_v60 = vadd.f32 %v1903_v53, %v1895_v45  ;;  %v2983_v57 = vld [vmem:[%s4354_s8 + $0x3] ss:$0 sm:$0xff] }
0x1b3d   :  { %3520 = vtanh.f32 %v1906_v59  ;;  %v1907_v21 = vmul.f32 0.7978846, %v1905_v60 }
0x1b3f   :  { %3522 = vtanh.f32 %v1907_v21 }
0x1b47   :  { %v3521_v24 = vpop.eup %3520 }
0x1b48   :  { %v1910_v27 = vadd.f32 1.0, %v3521_v24 }
0x1b49   :  { %v3523_v51 = vpop.eup %3522 }
0x1b4a   :  { %v1912_v2 = vmul.f32 0.5, %v1910_v27  ;;  %v1911_v3 = vadd.f32 1.0, %v3523_v51 }
0x1b4c   :  { %v1913_v55 = vmul.f32 0.5, %v1911_v3  ;;  %v1914_v63 = vmul.f32 %v1912_v2, %v1892_v42 }
0x1b4e   :  { %v1915_v34 = vmul.f32 %v1913_v55, %v1895_v45 }
0x1b50   :  { %v1916_v6 = vpack.c.bf16 %v1915_v34, %v1914_v63 }
0x1b52   :  { %3318 = vmatmul.mubr.bf16.vlgmr.msra.gmra.mrb[48].mxu1 %v1916_v6 }
0x1b53   :  { %3349 = vmatprep.mubr.msk.bf16.mxu1 %vm3581_vm1, %v3580_v15 }
0x1c25   :  { %v2003_v8 = vpop.f32.mrb[48].mxu1 }
0x1c26   :  { %v2004_v9 = vadd.f32 %v2003_v8, %v1920_v7  ;;  %v3319_v10 = vpop.f32.mrb[49].mxu1 }
0x1c27   :  { %v2006_v11 = vpop.f32.mrb[50].mxu1 }
0x1c28   :  { %v4156_v5 = vadd.f32 %v2004_v9, %v4088_v52  ;;  %v2007_v0 = vadd.f32 %v2006_v11, %v1920_v7  ;;  %v3320_v12 = vpop.f32.mrb[51].mxu1 }
0x1c2a   :  { %v4159_v13 = vadd.f32 %v2007_v0, %v4091_v58  ;;  %v2050_v1 = vsel %vm123_vm0, %v4156_v5, 0.0 }
0x1c2b   :  { %2051 = vadd.xlane.f32.xlu0 %v2050_v1 }
0x1c2c   :  { %v2053_v16 = vsel %vm123_vm0, %v4159_v13, 0.0 }
0x1c2d   :  { %2054 = vadd.xlane.f32.xlu1 %v2053_v16 }
0x1cb8   :  { %v2052_v14 = vpop.xlane.xlu0 %2051 }
0x1cb9   :  { %v2056_v17 = vmul.f32 0.03125, %v2052_v14 }
0x1cba   :  { %v2055_v18 = vpop.xlane.xlu1 %2054 }
0x1cbb   :  { %v2058_v20 = vsub.f32 %v4156_v5, %v2056_v17  ;;  %v2057_v52 = vmul.f32 0.03125, %v2055_v18 }
0x1cbd   :  { %v2059_v22 = vsub.f32 %v4159_v13, %v2057_v52  ;;  %v2060_v23 = vmul.f32 %v2058_v20, %v2058_v20 }
0x1cbf   :  { %v2062_v58 = vsel %vm123_vm0, %v2060_v23, 0.0  ;;  %v2061_v28 = vmul.f32 %v2059_v22, %v2059_v22 }
0x1cc0   :  { %2063 = vadd.xlane.f32.xlu0 %v2062_v58 }
0x1cc1   :  { %v2065_v33 = vsel %vm123_vm0, %v2061_v28, 0.0 }
0x1cc2   :  { %2066 = vadd.xlane.f32.xlu1 %v2065_v33 }
0x1d4d   :  { %v2064_v26 = vpop.xlane.xlu0 %2063 }
0x1d4e   :  { %v2068_v38 = vmul.f32 0.03125, %v2064_v26 }
0x1d4f   :  { %v2067_v39 = vpop.xlane.xlu1 %2066 }
0x1d50   :  { %v2070_v40 = vadd.f32 1e-05, %v2068_v38  ;;  %v2069_v31 = vmul.f32 0.03125, %v2067_v39 }
0x1d52   :  { %3524 = vrsqrt.f32 %v2070_v40  ;;  %v2071_v62 = vadd.f32 1e-05, %v2069_v31 }
0x1d54   :  { %3526 = vrsqrt.f32 %v2071_v62 }
0x1d5c   :  { %v3525_v42 = vpop.eup %3524 }
0x1d5d   :  { %v2074_v4 = vmul.f32 %v3525_v42, %v2058_v20 }
0x1d5e   :  { %v3527_v43 = vpop.eup %3526 }
0x1d5f   :  { %v2080_v44 = vmul.f32 %v2079_v35, %v2074_v4  ;;  %v2075_v45 = vmul.f32 %v3527_v43, %v2059_v22 }
0x1d61   :  { %v2081_v47 = vmul.f32 %v2079_v35, %v2075_v45  ;;  %v2086_v48 = vadd.f32 %v2085_v46, %v2080_v44 }
0x1d63   :  { %v2087_v49 = vadd.f32 %v2085_v46, %v2081_v47  ;;  %v3450_v46 = vld [vmem:[%s4350_s4 + $0x30] sm:$0xff]   ;;  %v3451_v47 = vld [vmem:[%s4350_s4 + $0x38] sm:$0xff]  }
0x1d65   :  { %v2088_v54 = vpack.c.bf16 %v2087_v49, %v2086_v48 }
0x1d67   :  { %3326 = vmatmul.mubr.msk.bf16.vlgmr.msra.gmra.mrb[44].mxu0 %vm123_vm0, %v2088_v54 }
0x1d68   :  { %3331 = vmatprep.mubr.msk.bf16.mxu0 %vm3581_vm1, %v3580_v15 }
0x1e3a   :  { %v2144_v53 = vpop.f32.mrb[44].mxu0 }
0x1e3b   :  { %v2145_v59 = vadd.f32 %v2983_v57, %v2144_v53  ;;  %v3327_v60 = vpop.f32.mrb[45].mxu0 }
0x1e3c   :  { %v2147_v21 = vpop.f32.mrb[46].mxu0 }
0x1e3d   :  { %v2151_v24 = vpack.c.bf16 %v2145_v59, %v2145_v59  ;;  %v2148_v27 = vadd.f32 %v2983_v57, %v2147_v21  ;;  %v3328_v51 = vpop.f32.mrb[47].mxu0 }
0x1e3f   :  { %v2152_v2 = vpack.c.bf16 %v2148_v27, %v2148_v27  ;;  %2154 = vrot.lane.b32.xlu0 %v2151_v24, %s3582_s19  ;;  %v2379_v27 = vrot.slane %v4180_v41, %v3770_v56 }
0x1e41   :  { %2203 = vrot.lane.b32.xlu1 %v2152_v2, %s3582_s19 }
0x1eb1   :  { %v2155_v3 = vpop.permute.xlu0 %2154 }
0x1eb2   :  { %v2160_v55 = vsel %vm123_vm0, %v2155_v3, 0 }
0x1eb3   :  { %3330 = vmatpush3.bf16.xpose.msra.mxu0 %v2160_v55  ;;  %v2204_v63 = vpop.permute.xlu1 %2203 }
0x1eb4   :  { %3335 = vmatprep.subr.bf16.mxu0 %v3580_v15  ;;  %v2209_v34 = vsel %vm123_vm0, %v2204_v63, 0 }
0x1eba   :  { %3332 = vmatmul.mubr.msk.bf16.vlgmr.msra.gmra.mrb[48].mxu0 %vm123_vm0, %v2151_v24 }
0x1ebb   :  { %3336 = vmatpush3.bf16.xpose.msra.mxu0 %v2209_v34  ;;  %3337 = vmatprep.mubr.msk.bf16.mxu0 %vm3581_vm1, %v3580_v15 }
0x1ebc   :  { %3341 = vmatprep.subr.bf16.mxu0 %v3580_v15 }
0x1ec2   :  { %3338 = vmatmul.mubr.msk.bf16.vlgmr.msra.gmra.mrb[52].mxu0 %vm123_vm0, %v2152_v2 }
0x1ec3   :  { %3343 = vmatprep.mubr.msk.bf16.mxu0 %vm3581_vm1, %v3580_v15 }
0x1f8d   :  { %v2196_v6 = vpop.f32.mrb[48].mxu0 }
0x1f8e   :  { %v2251_v7 = vmul.f32 0.17677669, %v2196_v6  ;;  %v3333_v8 = vpop.f32.mrb[49].mxu0 }
0x1f8f   :  { %v2199_v9 = vpop.f32.mrb[50].mxu0 }
0x1f90   :  { %v3334_v10 = vpop.f32.mrb[51].mxu0  ;;  %v2253_v11 = vadd.f32 %v2251_v7, %v4051_v50 }
0x1f92   :  { %v2255_v0 = vsel %vm330_vm2, %v2253_v11, -inf }
0x1f93   :  { %2256 = vmax.xlane.f32.xlu1 %v2255_v0 }
0x1f95   :  { %v2245_v12 = vpop.f32.mrb[52].mxu0 }
0x1f96   :  { %v2252_v1 = vmul.f32 0.17677669, %v2245_v12  ;;  %v3339_v16 = vpop.f32.mrb[53].mxu0 }
0x1f97   :  { %v2248_v14 = vpop.f32.mrb[54].mxu0 }
0x1f98   :  { %v3340_v17 = vpop.f32.mrb[55].mxu0  ;;  %v2254_v18 = vadd.f32 %v2252_v1, %v4056_v61 }
0x1f99   :  { %v3452_v17 = vld [vmem:[%s4351_s5 + $0x30] sm:$0xff]  }
0x1f9a   :  { %v2258_v20 = vsel %vm330_vm2, %v2254_v18, -inf }
0x1f9b   :  { %2259 = vmax.xlane.f32.xlu0 %v2258_v20 }
0x2020   :  { %v2257_v52 = vpop.xlane.xlu1 %2256 }
0x2021   :  { %v2261_v22 = vsub.f32 %v2253_v11, %v2257_v52 }
0x2023   :  { %v2263_v23 = vmul.f32 1.442695, %v2261_v22 }
0x2025   :  { %3528 = vpow2.f32 %v2263_v23 }
0x2028   :  { %v2260_v58 = vpop.xlane.xlu0 %2259 }
0x2029   :  { %v2262_v28 = vsub.f32 %v2254_v18, %v2260_v58  ;;  %v3453_v18 = vld [vmem:[%s4351_s5 + $0x38] sm:$0xff]  }
0x202b   :  { %v2265_v50 = vmul.f32 1.442695, %v2262_v28 }
0x202d   :  { %3530 = vpow2.f32 %v2265_v50  ;;  %v2467_v50 = vrot.slane %v4180_v41, %v3797_v29  ;;  %v3454_v29 = vld [vmem:[%s4352_s6 + $0xc0] sm:$0xff]  }
0x202f   :  { %v3529_v33 = vpop.eup %3528 }
0x2030   :  { %v2267_v36 = vsel %vm330_vm2, %v3529_v33, 0.0 }
0x2031   :  { %2268 = vadd.xlane.f32.xlu0 %v2267_v36 }
0x2037   :  { %v3531_v37 = vpop.eup %3530 }
0x2038   :  { %v2270_v26 = vsel %vm330_vm2, %v3531_v37, 0.0 }
0x2039   :  { %2271 = vadd.xlane.f32.xlu1 %v2270_v26 }
0x2047   :  { %2279 = vrot.lane.b32.xlu0 %v2151_v24, %s3584_s1 }
0x204a   :  { %2327 = vrot.lane.b32.xlu1 %v2152_v2, %s3584_s1 }
0x20be   :  { %v2269_v61 = vpop.xlane.xlu0 %2268 }
0x20bf   :  { %3532 = vrcp.f32 %v2269_v61 }
0x20c2   :  { %v2280_v38 = vpop.permute.xlu0 %2279 }
0x20c3   :  { %v2285_v39 = vsel %vm360_vm3, %v2280_v38, 0  ;;  %v2473_v38 = vrot.slane %v4180_v41, %v3802_v32  ;;  %v3455_v32 = vld [vmem:[%s4352_s6 + $0xc8] sm:$0xff]  }
0x20c4   :  { %3342 = vmatpush3.bf16.msra.mxu0 %v2285_v39 }
0x20c5   :  { %3353 = vmatprep.subr.bf16.mxu0 %v3580_v15 }
0x20c6   :  { %v2272_v40 = vpop.xlane.xlu1 %2271 }
0x20c7   :  { %3534 = vrcp.f32 %v2272_v40 }
0x20c9   :  { %v3533_v31 = vpop.eup %3532 }
0x20ca   :  { %v2274_v62 = vmul.f32 %v3533_v31, %v3529_v33  ;;  %v2328_v35 = vpop.permute.xlu1 %2327 }
0x20cb   :  { %v2333_v42 = vsel %vm360_vm3, %v2328_v35, 0  ;;  %v3456_v35 = vld [vmem:[%s4352_s6 + $0xd0] sm:$0xff]  }
0x20cc   :  { %3348 = vmatpush3.bf16.msra.mxu1 %v2333_v42  ;;  %v2277_v4 = vpack.c.bf16 %v2274_v62, %v2274_v62  ;;  %v3457_v42 = vld [vmem:[%s4352_s6 + $0xd8] sm:$0xff]  }
0x20cd   :  { %3361 = vmatprep.subr.bf16.mxu1 %v3580_v15 }
0x20ce   :  { %3344 = vmatmul.mubr.msk.bf16.vlgmr.msra.gmra.mrb[56].mxu0 %vm330_vm2, %v2277_v4  ;;  %v3458_v4 = vld [vmem:[%s4352_s6 + $0xe0] sm:$0xff]  }
0x20cf   :  { %3357 = vmatprep.mubr.msk.bf16.mxu0 %vm3581_vm1, %v3580_v15  ;;  %3354 = vmatpush3.bf16.msra.mxu0 %v3450_v46  ;;  %v2994_v46 = vld [vmem:[%s4355_s9 + $0x3] ss:$0 sm:$0xff] }
0x20d0   :  { %3355 = vmatprep.subr.bf16.mxu0 %v3580_v15 }
0x20d1   :  { %v3535_v43 = vpop.eup %3534 }
0x20d2   :  { %v2276_v44 = vmul.f32 %v3535_v43, %v3531_v37  ;;  %v3459_v43 = vld [vmem:[%s4352_s6 + $0xe8] sm:$0xff]  }
0x20d3   :  { %3356 = vmatpush3.bf16.msra.mxu0 %v3451_v47 }
0x20d4   :  { %v2278_v45 = vpack.c.bf16 %v2276_v44, %v2276_v44  ;;  %3369 = vmatprep.subr.bf16.mxu0 %v3580_v15  ;;  %v3460_v44 = vld [vmem:[%s4352_s6 + $0xf0] sm:$0xff]  }
0x20d6   :  { %3350 = vmatmul.mubr.msk.bf16.vlgmr.msra.gmra.mrb[52].mxu1 %vm330_vm2, %v2278_v45  ;;  %v3461_v45 = vld [vmem:[%s4352_s6 + $0xf8] sm:$0xff]  }
0x20d7   :  { %3365 = vmatprep.mubr.msk.bf16.mxu1 %vm3581_vm1, %v3580_v15  ;;  %3362 = vmatpush3.bf16.msra.mxu1 %v3452_v17 }
0x20d8   :  { %3363 = vmatprep.subr.bf16.mxu1 %v3580_v15 }
0x20db   :  { %3364 = vmatpush3.bf16.msra.mxu1 %v3453_v18 }
0x20dc   :  { %3389 = vmatprep.subr.bf16.mxu1 %v3580_v15 }
0x21a1   :  { %v2321_v48 = vpop.f32.mrb[56].mxu0 }
0x21a2   :  { %v3345_v49 = vpop.f32.mrb[57].mxu0 }
0x21a3   :  { %v2324_v54 = vpop.f32.mrb[58].mxu0 }
0x21a4   :  { %v3346_v57 = vpop.f32.mrb[59].mxu0 }
0x21a9   :  { %v2369_v53 = vpop.f32.mrb[52].mxu1 }
0x21aa   :  { %v2375_v59 = vpack.c.bf16 %v2369_v53, %v2321_v48  ;;  %v3351_v60 = vpop.f32.mrb[53].mxu1 }
0x21ab   :  { %v2372_v21 = vpop.f32.mrb[54].mxu1 }
0x21ac   :  { %v3352_v24 = vpop.f32.mrb[55].mxu1  ;;  %3358 = vmatmul.mubr.msk.bf16.vlgmr.msra.gmra.mrb[60].mxu0 %vm123_vm0, %v2375_v59 }
0x21ad   :  { %3385 = vmatprep.mubr.msk.bf16.mxu0 %vm3581_vm1, %v3580_v15  ;;  %3370 = vmatpush3.bf16.msra.mxu0 %v3454_v29 }
0x21ae   :  { %3371 = vmatprep.subr.bf16.mxu0 %v3580_v15 }
0x21b1   :  { %3372 = vmatpush3.bf16.msra.mxu0 %v3455_v32 }
0x21b2   :  { %3373 = vmatprep.subr.bf16.mxu0 %v3580_v15 }
0x21b5   :  { %3374 = vmatpush3.bf16.msra.mxu0 %v3456_v35  ;;  %v2653_v35 = vld [vmem:[%s4356_s10] sm:$0x3] }
0x21b6   :  { %3375 = vmatprep.subr.bf16.mxu0 %v3580_v15 }
0x21b9   :  { %3376 = vmatpush3.bf16.msra.mxu0 %v3457_v42  ;;  %v2683_v42 = vrot.slane %v2653_v35, %v3693_v25 }
0x21ba   :  { %3377 = vmatprep.subr.bf16.mxu0 %v3580_v15 }
0x21bd   :  { %3378 = vmatpush3.bf16.msra.mxu0 %v3458_v4 }
0x21be   :  { %3379 = vmatprep.subr.bf16.mxu0 %v3580_v15 }
0x21c1   :  { %3380 = vmatpush3.bf16.msra.mxu0 %v3459_v43 }
0x21c2   :  { %3381 = vmatprep.subr.bf16.mxu0 %v3580_v15 }
0x21c5   :  { %3382 = vmatpush3.bf16.msra.mxu0 %v3460_v44 }
0x21c6   :  { %3383 = vmatprep.subr.bf16.mxu0 %v3580_v15 }
0x21c9   :  { %3384 = vmatpush3.bf16.msra.mxu0 %v3461_v45 }
0x227f   :  { %v2429_v51 = vpop.f32.mrb[60].mxu0 }
0x2280   :  { %v2430_v2 = vadd.f32 %v2429_v51, %v2379_v27  ;;  %v3359_v3 = vpop.f32.mrb[61].mxu0 }
0x2281   :  { %v2432_v55 = vpop.f32.mrb[62].mxu0 }
0x2282   :  { %v4236_v63 = vadd.f32 %v2430_v2, %v4156_v5  ;;  %v2433_v34 = vadd.f32 %v2432_v55, %v2379_v27  ;;  %v3360_v6 = vpop.f32.mrb[63].mxu0 }
0x2284   :  { %v4239_v7 = vadd.f32 %v2433_v34, %v4159_v13  ;;  %v2438_v8 = vsel %vm123_vm0, %v4236_v63, 0.0 }
0x2285   :  { %2439 = vadd.xlane.f32.xlu1 %v2438_v8 }
0x2286   :  { %v2441_v9 = vsel %vm123_vm0, %v4239_v7, 0.0 }
0x2287   :  { %2442 = vadd.xlane.f32.xlu0 %v2441_v9 }
0x2312   :  { %v2440_v56 = vpop.xlane.xlu1 %2439 }
0x2313   :  { %v2444_v10 = vmul.f32 0.03125, %v2440_v56 }
0x2314   :  { %v2443_v11 = vpop.xlane.xlu0 %2442 }
0x2315   :  { %v2446_v0 = vsub.f32 %v4236_v63, %v2444_v10  ;;  %v2445_v5 = vmul.f32 0.03125, %v2443_v11 }
0x2317   :  { %v2447_v12 = vsub.f32 %v4239_v7, %v2445_v5  ;;  %v2448_v1 = vmul.f32 %v2446_v0, %v2446_v0 }
0x2319   :  { %v2450_v13 = vsel %vm123_vm0, %v2448_v1, 0.0  ;;  %v2449_v16 = vmul.f32 %v2447_v12, %v2447_v12  ;;  %v2561_v1 = vrot.slane %v4180_v41, %v3847_v19 }
0x231a   :  { %2451 = vadd.xlane.f32.xlu0 %v2450_v13 }
0x231b   :  { %v2453_v14 = vsel %vm123_vm0, %v2449_v16, 0.0 }
0x231c   :  { %2454 = vadd.xlane.f32.xlu1 %v2453_v14 }
0x23a7   :  { %v2452_v20 = vpop.xlane.xlu0 %2451 }
0x23a8   :  { %v2456_v52 = vmul.f32 0.03125, %v2452_v20 }
0x23a9   :  { %v2455_v22 = vpop.xlane.xlu1 %2454 }
0x23aa   :  { %v2458_v23 = vadd.f32 1e-05, %v2456_v52  ;;  %v2457_v58 = vmul.f32 0.03125, %v2455_v22 }
0x23ac   :  { %3536 = vrsqrt.f32 %v2458_v23  ;;  %v2459_v28 = vadd.f32 1e-05, %v2457_v58 }
0x23ae   :  { %3538 = vrsqrt.f32 %v2459_v28 }
0x23b6   :  { %v3537_v33 = vpop.eup %3536 }
0x23b7   :  { %v2462_v36 = vmul.f32 %v3537_v33, %v2446_v0 }
0x23b8   :  { %v3539_v37 = vpop.eup %3538 }
0x23b9   :  { %v2468_v26 = vmul.f32 %v2467_v50, %v2462_v36  ;;  %v2463_v61 = vmul.f32 %v3539_v37, %v2447_v12 }
0x23bb   :  { %v2469_v39 = vmul.f32 %v2467_v50, %v2463_v61  ;;  %v2474_v40 = vadd.f32 %v2473_v38, %v2468_v26 }
0x23bd   :  { %v2475_v31 = vadd.f32 %v2473_v38, %v2469_v39  ;;  %v3463_v38 = vld [vmem:[%s4357_s11 + $0x8] sm:$0xff]  }
0x23bf   :  { %v2476_v62 = vpack.c.bf16 %v2475_v31, %v2474_v40 }
0x23c1   :  { %3366 = vmatmul.mubr.msk.bf16.vlgmr.msra.gmra.mrb[56].mxu1 %vm123_vm0, %v2476_v62 }
0x23c2   :  { %3393 = vmatprep.mubr.msk.bf16.mxu1 %vm3581_vm1, %v3580_v15 }
0x2494   :  { %v2532_v47 = vpop.f32.mrb[56].mxu1 }
0x2495   :  { %v2533_v48 = vadd.f32 %v2994_v46, %v2532_v47  ;;  %v3367_v49 = vpop.f32.mrb[57].mxu1 }
0x2496   :  { %v2535_v54 = vpop.f32.mrb[58].mxu1 }
0x2497   :  { %v2539_v57 = vmul.f32 %v2533_v48, %v2533_v48  ;;  %v2536_v53 = vadd.f32 %v2994_v46, %v2535_v54  ;;  %v3368_v59 = vpop.f32.mrb[59].mxu1  ;;  %v2689_v46 = vrot.slane %v2653_v35, %v3703_v30 }
0x2499   :  { %v2541_v60 = vmul.f32 %v2539_v57, %v2533_v48  ;;  %v2540_v21 = vmul.f32 %v2536_v53, %v2536_v53  ;;  %v3006_v57 = vld [vmem:[%s4358_s12] ss:$0 sm:$0xff] }
0x249b   :  { %v2543_v24 = vmul.f32 0.044715, %v2541_v60  ;;  %v2542_v27 = vmul.f32 %v2540_v21, %v2536_v53 }
0x249d   :  { %v2545_v51 = vadd.f32 %v2543_v24, %v2533_v48  ;;  %v2544_v2 = vmul.f32 0.044715, %v2542_v27 }
0x249f   :  { %v2547_v3 = vmul.f32 0.7978846, %v2545_v51  ;;  %v2546_v55 = vadd.f32 %v2544_v2, %v2536_v53 }
0x24a1   :  { %3540 = vtanh.f32 %v2547_v3  ;;  %v2548_v34 = vmul.f32 0.7978846, %v2546_v55 }
0x24a3   :  { %3542 = vtanh.f32 %v2548_v34 }
0x24ab   :  { %v3541_v6 = vpop.eup %3540 }
0x24ac   :  { %v2551_v8 = vadd.f32 1.0, %v3541_v6 }
0x24ad   :  { %v3543_v9 = vpop.eup %3542 }
0x24ae   :  { %v2553_v56 = vmul.f32 0.5, %v2551_v8  ;;  %v2552_v10 = vadd.f32 1.0, %v3543_v9 }
0x24b0   :  { %v2554_v11 = vmul.f32 0.5, %v2552_v10  ;;  %v2555_v0 = vmul.f32 %v2553_v56, %v2533_v48 }
0x24b2   :  { %v2556_v5 = vmul.f32 %v2554_v11, %v2536_v53 }
0x24b4   :  { %v2557_v12 = vpack.c.bf16 %v2556_v5, %v2555_v0 }
0x24b6   :  { %3386 = vmatmul.mubr.bf16.vlgmr.msra.gmra.mrb[64].mxu0 %v2557_v12 }
0x2589   :  { %v2644_v13 = vpop.f32.mrb[64].mxu0 }
0x258a   :  { %v2645_v16 = vadd.f32 %v2644_v13, %v2561_v1  ;;  %v3387_v14 = vpop.f32.mrb[65].mxu0 }
0x258b   :  { %v2647_v17 = vpop.f32.mrb[66].mxu0  ;;  %v2787_v14 = vld [vmem:[%s4348_s2] sm:$0xff] }
0x258c   :  { %v2648_v18 = vadd.f32 %v2647_v17, %v2561_v1  ;;  %v3388_v20 = vpop.f32.mrb[67].mxu0  ;;  %v2651_v52 = vadd.f32 %v2645_v16, %v4236_v63 }
0x258d   :  { %v2788_v20 = vld [vmem:[%s4348_s2 + $0x8] sm:$0xff] }
0x258e   :  { %v2654_v22 = vsel %vm123_vm0, %v2651_v52, 0.0  ;;  %v2652_v23 = vadd.f32 %v2648_v18, %v4239_v7  ;;  %v3462_v7 = vld [vmem:[%s4357_s11] sm:$0xff]  }
0x258f   :  { %2655 = vadd.xlane.f32.xlu0 %v2654_v22  ;;  %3390 = vmatpush3.bf16.msra.mxu1 %v3462_v7 }
0x2590   :  { %v2657_v58 = vsel %vm123_vm0, %v2652_v23, 0.0  ;;  %3391 = vmatprep.subr.bf16.mxu1 %v3580_v15 }
0x2591   :  { %2658 = vadd.xlane.f32.xlu1 %v2657_v58 }
0x2593   :  { %3392 = vmatpush3.bf16.msra.mxu1 %v3463_v38 }
0x261c   :  { %v2656_v28 = vpop.xlane.xlu0 %2655 }
0x261d   :  { %v2660_v50 = vmul.f32 0.03125, %v2656_v28 }
0x261e   :  { %v2659_v33 = vpop.xlane.xlu1 %2658 }
0x261f   :  { %v2662_v19 = vsub.f32 %v2651_v52, %v2660_v50  ;;  %v2661_v41 = vmul.f32 0.03125, %v2659_v33 }
0x2621   :  { %v2663_v36 = vsub.f32 %v2652_v23, %v2661_v41  ;;  %v2664_v37 = vmul.f32 %v2662_v19, %v2662_v19 }
0x2623   :  { %v2666_v26 = vsel %vm123_vm0, %v2664_v37, 0.0  ;;  %v2665_v61 = vmul.f32 %v2663_v36, %v2663_v36 }
0x2624   :  { %2667 = vadd.xlane.f32.xlu0 %v2666_v26 }
0x2625   :  { %v2669_v63 = vsel %vm123_vm0, %v2665_v61, 0.0 }
0x2626   :  { %2670 = vadd.xlane.f32.xlu1 %v2669_v63 }
0x26b1   :  { %v2668_v39 = vpop.xlane.xlu0 %2667 }
0x26b2   :  { %v2672_v40 = vmul.f32 0.03125, %v2668_v39 }
0x26b3   :  { %v2671_v31 = vpop.xlane.xlu1 %2670 }
0x26b4   :  { %v2674_v62 = vadd.f32 1e-05, %v2672_v40  ;;  %v2673_v29 = vmul.f32 0.03125, %v2671_v31 }
0x26b6   :  { %3544 = vrsqrt.f32 %v2674_v62  ;;  %v2675_v32 = vadd.f32 1e-05, %v2673_v29 }
0x26b8   :  { %3546 = vrsqrt.f32 %v2675_v32 }
0x26c0   :  { %v3545_v15 = vpop.eup %3544 }
0x26c1   :  { %v2678_v4 = vmul.f32 %v3545_v15, %v2662_v19 }
0x26c2   :  { %v3547_v43 = vpop.eup %3546 }
0x26c3   :  { %v2684_v44 = vmul.f32 %v2683_v42, %v2678_v4  ;;  %v2679_v45 = vmul.f32 %v3547_v43, %v2663_v36 }
0x26c5   :  { %v2685_v47 = vmul.f32 %v2683_v42, %v2679_v45  ;;  %v2690_v48 = vadd.f32 %v2689_v46, %v2684_v44 }
0x26c7   :  { %v2691_v49 = vadd.f32 %v2689_v46, %v2685_v47 }
0x26c9   :  { %v2692_v54 = vpack.c.bf16 %v2691_v49, %v2690_v48 }
0x26cb   :  { %3394 = vmatmul.mubr.msk.bf16.vlgmr.msra.gmra.mrb[60].mxu1 %vm123_vm0, %v2692_v54 }
0x279e   :  { %v2753_v53 = vpop.f32.mrb[60].mxu1 }
0x279f   :  { %v2754_v25 = vadd.f32 %v3006_v57, %v2753_v53  ;;  %v3395_v59 = vpop.f32.mrb[61].mxu1 }
0x27a0   :  { %v2756_v60 = vpop.f32.mrb[62].mxu1 }
0x27a1   :  { %v2757_v21 = vadd.f32 %v3006_v57, %v2756_v60  ;;  %v3396_v24 = vpop.f32.mrb[63].mxu1  ;;  %v2761_v27 = vsel %vm2760_vm5, %v2754_v25, -inf }
0x27a2   :  { %2762 = vmax.xlane.f32.xlu0 %v2761_v27 }
0x27a3   :  { %v2764_v30 = vsel %vm2760_vm5, %v2757_v21, -inf }
0x27a4   :  { %2765 = vmax.xlane.f32.xlu1 %v2764_v30 }
0x282f   :  { %v2763_v51 = vpop.xlane.xlu0 %2762 }
0x2830   :  { %v2767_v2 = vsub.f32 %v2754_v25, %v2763_v51 }
0x2831   :  { %v2766_v3 = vpop.xlane.xlu1 %2765 }
0x2832   :  { %v2769_v55 = vmul.f32 1.442695, %v2767_v2  ;;  %v2768_v34 = vsub.f32 %v2757_v21, %v2766_v3 }
0x2834   :  { %3548 = vpow2.f32 %v2769_v55  ;;  %v2771_v6 = vmul.f32 1.442695, %v2768_v34 }
0x2836   :  { %3550 = vpow2.f32 %v2771_v6 }
0x283e   :  { %v3549_v8 = vpop.eup %3548 }
0x283f   :  { %v2773_v9 = vsel %vm2760_vm5, %v3549_v8, 0.0 }
0x2840   :  { %v3551_v56 = vpop.eup %3550  ;;  %2774 = vadd.xlane.f32.xlu0 %v2773_v9 }
0x2841   :  { %v2776_v10 = vsel %vm2760_vm5, %v3551_v56, 0.0 }
0x2842   :  { %2777 = vadd.xlane.f32.xlu1 %v2776_v10 }
0x28cd   :  { %v2775_v11 = vpop.xlane.xlu0 %2774 }
0x28ce   :  { %3552 = vlog2.f32 %v2775_v11 }
0x28cf   :  { %v2778_v0 = vpop.xlane.xlu1 %2777 }
0x28d0   :  { %3554 = vlog2.f32 %v2778_v0 }
0x28d8   :  { %v3553_v5 = vpop.eup %3552 }
0x28d9   :  { %v2780_v12 = vmul.f32 0.6931472, %v3553_v5 }
0x28da   :  { %v3555_v1 = vpop.eup %3554 }
0x28db   :  { %v2783_v13 = vadd.f32 %v2780_v12, %v2763_v51  ;;  %v2782_v16 = vmul.f32 0.6931472, %v3555_v1 }
0x28dd   :  { %v2784_v17 = vadd.f32 %v2782_v16, %v2766_v3  ;;  %v2785_v18 = vsub.f32 %v2754_v25, %v2783_v13 }
0x28df   :  { %v2786_v52 = vsub.f32 %v2757_v21, %v2784_v17  ;;  %v2789_v22 = vmul.f32 %v2787_v14, %v2785_v18 }
0x28e1   :  { %v2790_v23 = vmul.f32 %v2788_v20, %v2786_v52  ;;  %v2791_v58 = vsel %vm2760_vm5, %v2789_v22, 0.0 }
0x28e3   :  { %v2792_v28 = vsel %vm2760_vm5, %v2790_v23, 0.0 }
0x28e4   :  { %v2793_v50 = vadd.f32 %v2792_v28, %v2791_v58 }
0x28e6   :  { %2794 = vadd.xlane.f32.xlu0 %v2793_v50 }
0x2973   :  { %v2795_v33 = vpop.xlane.xlu0 %2794 }
0x2974   :  { %v2796_v19 = vrot.slane %v2795_v33, 4 }
0x2976   :  { %v2797_v41 = vadd.f32 %v2796_v19, %v2795_v33 }
0x2978   :  { %v2798_v36 = vrot.slane %v2797_v41, 2 }
0x297a   :  { %v2799_v37 = vadd.f32 %v2798_v36, %v2797_v41 }
0x297c   :  { %v2800_v26 = vrot.slane %v2799_v37, 1 }
0x297e   :  { %v2801_v61 = vadd.f32 %v2800_v26, %v2799_v37 }
0x2980   :  { %3397 = vpush %v2801_v61 }
0x29b1   :  { %s3398_s2 = spop %3397 }
0x29b2   :  { %v2803_v63 = vstv %s3398_s2 }
0x29b3   :  { %v2804_v7 = vsub.f32 0.0, %v2803_v63 }
0x29b5   :  { %2806 = vst.msk [vmem:[#allocation2] sm:$0x1] %vm2805_vm6, %v2804_v7 }
0x29b6   :  { %3567 = shalt.err (!%p3564_p4)
}
0x29b7   :  { %s3568_s29 = scalar_lea.hbm %s4359_s13, 16 }
0x29b8   :  { %p3569_p5 = scmp.ne.s32.totalorder %s4359_s13, %s3568_s29  ;;  %p3572_p6 = scmp.lt.u32.totalorder %s3568_s29, %s4359_s13 }
0x29ba   :  { %p3574_p7 = pnand %p3572_p6, %p3569_p5 }
0x29bc   :  { %3577 = shalt.err (!%p3574_p7)
}
0x29bd   :  { %2816 = dma.vmem_to_hbm [thread:$0]  %s2814_s25, 16, %s4359_s13, [#allocation3]  }
0x29be   :  { %3578 = dma.done.wait [#allocation3], 16  }
0x29bf   :  { %3579 = vsyncadd [#allocation3], 4294967280 }
0x29c0   :  { %2820 = vsyncpa [#allocation3], 1 }

</bundles_post_ra>
